<compile_context>
chip_gen: v5e
topology: v5e:2x2
jax: 0.10.0
libtpu: 0.0.40
codegen_flags: <defaults>
</compile_context>

<pallas_src>
import functools

import jax
import jax.numpy as jnp
from jax.experimental import pallas as pl
from jax.experimental.pallas import tpu as pltpu


def ensemble_kernel(feat_ref, mask_ref,
                    wh_ref, bh_ref,      # fused heads   (H, 3*Cp), (1, 3*Cp)
                    wc_ref, bc_ref,      # classifier    (3*Cp, Cp), (1, Cp)
                    out_ref,             # (TB, Cp)
                    sum_acc, cnt_acc):   # VMEM scratch  (TB, H), (TB, 1)
    s = pl.program_id(1)

    @pl.when(s == 0)
    def _init():
        sum_acc[...] = jnp.zeros_like(sum_acc)
        cnt_acc[...] = jnp.zeros_like(cnt_acc)

    # Streaming masked-sum reduction over the sequence tile.
    feat = feat_ref[...].astype(jnp.float32)        # bf16 -> f32 (spare VALU slots)
    mask = mask_ref[...]                            # (TB, TS) f32
    sum_acc[...] += jnp.sum(feat * mask[:, :, None], axis=1)       # (TB, H)
    cnt_acc[...] += jnp.sum(mask, axis=1, keepdims=True)           # (TB, 1)

    @pl.when(s == pl.num_programs(1) - 1)
    def _finalize():
        cnt = jnp.maximum(cnt_acc[...], 1.0)
        # exact reciprocal keeps bit-level parity with the reference;
        # pl.reciprocal(cnt, approx=True) is available if tolerance allows.
        pooled = sum_acc[...] * pl.reciprocal(cnt, approx=False)   # (TB, H)

        # txt1|txt2|txt3 = one fused matmul (concat == block columns of wh).
        heads = (jnp.dot(pooled, wh_ref[...],
                         preferred_element_type=jnp.float32) + bh_ref[...])
        # self.cls : Linear(3C -> C) on the padded, lane-dense layout.
        out_ref[...] = (jnp.dot(heads, wc_ref[...],
                                preferred_element_type=jnp.float32) + bc_ref[...])


def pack_params(params, num_classes, lane=128):
    """Fuse the three heads and pad the class dim up to a multiple of 128."""
    C = num_classes
    Cp = ((C + lane - 1) // lane) * lane
    H = params["w1"].shape[0]

    wh = jnp.zeros((H, 3 * Cp), jnp.float32)
    bh = jnp.zeros((1, 3 * Cp), jnp.float32)
    wc = jnp.zeros((3 * Cp, Cp), jnp.float32)
    bc = jnp.zeros((1, Cp), jnp.float32)
    for i, tag in enumerate(("1", "2", "3")):
        wh = wh.at[:, i * Cp:i * Cp + C].set(params["w" + tag])
        bh = bh.at[:, i * Cp:i * Cp + C].set(params["b" + tag])
        wc = wc.at[i * Cp:i * Cp + C, :C].set(params["w_cls"][i * C:(i + 1) * C, :])
    bc = bc.at[:, :C].set(params["b_cls"])
    return {"w_heads": wh, "b_heads": bh, "w_cls": wc, "b_cls": bc,
            "C": C, "Cp": Cp}


@functools.partial(jax.jit, static_argnames=("tb", "ts"))
def _ensemble_call(text_features, attention_mask, wh, bh, wc, bc, *, tb, ts):
    B, S, H = text_features.shape
    Cp = wc.shape[-1]
    TB, TS = tb, ts
    grid = (B // TB, S // TS)

    return pl.pallas_call(
        ensemble_kernel,
        out_shape=jax.ShapeDtypeStruct((B, Cp), jnp.float32),
        grid_spec=pltpu.PrefetchScalarGridSpec(
            num_scalar_prefetch=0,
            grid=grid,
            in_specs=[
                pl.BlockSpec((TB, TS, H), lambda b, s: (b, s, 0)),   # feature stream
                pl.BlockSpec((TB, TS), lambda b, s: (b, s)),         # mask stream
                pl.BlockSpec((H, 3 * Cp), lambda b, s: (0, 0)),      # resident weights
                pl.BlockSpec((1, 3 * Cp), lambda b, s: (0, 0)),
                pl.BlockSpec((3 * Cp, Cp), lambda b, s: (0, 0)),
                pl.BlockSpec((1, Cp), lambda b, s: (0, 0)),
            ],
            out_specs=pl.BlockSpec((TB, Cp), lambda b, s: (b, 0)),   # resident over S
            scratch_shapes=[
                pltpu.VMEM((TB, H), jnp.float32),   # masked-sum accumulator
                pltpu.VMEM((TB, 1), jnp.float32),   # mask-count accumulator
            ],
        ),
        compiler_params=pltpu.CompilerParams(
            dimension_semantics=("parallel", "arbitrary"),
            vmem_limit_bytes=48 * 1024 * 1024,
        ),
    )(text_features, attention_mask, wh, bh, wc, bc)


def nlp_ensemble_quad(text_features, attention_mask, token_type_ids, packed,
                      *, tb=8, ts=128):
    # TODO(synk): token_type_ids is consumed by the real BERT/XLM backbones;
    # the synthetic pooled-linear heads have no use for it.
    del token_type_ids
    B, S, H = text_features.shape
    TB = min(tb, B)
    TS = min(ts, S)
    assert B % TB == 0 and S % TS == 0, "demo shapes must tile evenly"

    out = _ensemble_call(
        text_features,                               # keep bf16: halves HBM bytes
        attention_mask.astype(jnp.float32),
        packed["w_heads"], packed["b_heads"], packed["w_cls"], packed["b_cls"],
        tb=TB, ts=TS,
    )
    return out[:, :packed["C"]]


def init_params(key, hidden, num_classes):
    ks = jax.random.split(key, 8)
    scale_h = 1.0 / jnp.sqrt(hidden)
    scale_c = 1.0 / jnp.sqrt(3 * num_classes)
    # weights stored as (in, out) == PyTorch weight.T
    return {
        "w1": jax.random.normal(ks[0], (hidden, num_classes), jnp.float32) * scale_h,
        "b1": jax.random.normal(ks[1], (1, num_classes), jnp.float32) * scale_h,
        "w2": jax.random.normal(ks[2], (hidden, num_classes), jnp.float32) * scale_h,
        "b2": jax.random.normal(ks[3], (1, num_classes), jnp.float32) * scale_h,
        "w3": jax.random.normal(ks[4], (hidden, num_classes), jnp.float32) * scale_h,
        "b3": jax.random.normal(ks[5], (1, num_classes), jnp.float32) * scale_h,
        "w_cls": jax.random.normal(ks[6], (3 * num_classes, num_classes), jnp.float32) * scale_c,
        "b_cls": jax.random.normal(ks[7], (1, num_classes), jnp.float32) * scale_c,
    }


def reference(text_features_f32, attention_mask, params):
    m = attention_mask[:, :, None]
    pooled = (jnp.sum(text_features_f32 * m, axis=1)
              / jnp.maximum(jnp.sum(m, axis=1), 1.0))
    t1 = pooled @ params["w1"] + params["b1"]
    t2 = pooled @ params["w2"] + params["b2"]
    t3 = pooled @ params["w3"] + params["b3"]
    combined = jnp.concatenate([t1, t2, t3], axis=1)
    return combined @ params["w_cls"] + params["b_cls"]


if __name__ == "__main__":
    # Small but tile-aligned demo shapes (grid = (1, 2): exercises the S reduction).
    B, S, H, C = 8, 256, 128, 20

    key = jax.random.PRNGKey(0)
    k_feat, k_mask, k_params = jax.random.split(key, 3)

    feat_f32 = jax.random.normal(k_feat, (B, S, H), jnp.float32)
    text_features = feat_f32.astype(jnp.bfloat16)          # bf16 feature stream
    attention_mask = (jax.random.uniform(k_mask, (B, S)) > 0.2).astype(jnp.float32)
    token_type_ids = jnp.zeros((B, S), jnp.int32)

    params = init_params(k_params, H, C)
    packed = pack_params(params, C)

    out = nlp_ensemble_quad(text_features, attention_mask, token_type_ids, packed)
    out = jax.block_until_ready(out)

    # Reference uses the same bf16-rounded features (kernel accumulates in f32).
    ref = reference(text_features.astype(jnp.float32), attention_mask, params)
    assert out.shape == (B, C)
    assert jnp.allclose(out, ref, atol=2e-4, rtol=2e-4), \
        float(jnp.max(jnp.abs(out - ref)))

    print("KERNEL_OK")
</pallas_src>

<mosaic_0001>
module attributes {stable_mosaic.version = 11 : i64} {
  func.func @ensemble_kernel(%arg0: i32, %arg1: i32, %arg2: memref<8x128x128xbf16, #tpu.memory_space<vmem>>, %arg3: memref<8x128xf32, #tpu.memory_space<vmem>>, %arg4: memref<128x384xf32, #tpu.memory_space<vmem>>, %arg5: memref<1x384xf32, #tpu.memory_space<vmem>>, %arg6: memref<384x128xf32, #tpu.memory_space<vmem>>, %arg7: memref<1x128xf32, #tpu.memory_space<vmem>>, %arg8: memref<8x128xf32, #tpu.memory_space<vmem>>, %arg9: memref<8x128xf32, #tpu.memory_space<vmem>>, %arg10: memref<8x1xf32, #tpu.memory_space<vmem>>) attributes {dimension_semantics = [#tpu.dimension_semantics<parallel>, #tpu.dimension_semantics<arbitrary>], iteration_bounds = array<i64: 1, 2>, scalar_prefetch = 0 : i64, scratch_operands = 2 : i64, tpu.core_type = #tpu.core_type<tc>, window_params = [{transform_indices = @transform_0, window_bounds = array<i64: 8, 128, 128>}, {transform_indices = @transform_1, window_bounds = array<i64: 8, 128>}, {pipeline_mode = #tpu.pipeline_mode<synchronous>, transform_indices = @transform_2, window_bounds = array<i64: 128, 384>}, {pipeline_mode = #tpu.pipeline_mode<synchronous>, transform_indices = @transform_3, window_bounds = array<i64: 1, 384>}, {pipeline_mode = #tpu.pipeline_mode<synchronous>, transform_indices = @transform_4, window_bounds = array<i64: 384, 128>}, {pipeline_mode = #tpu.pipeline_mode<synchronous>, transform_indices = @transform_5, window_bounds = array<i64: 1, 128>}, {transform_indices = @transform_6, window_bounds = array<i64: 8, 128>}]} {
    %c0_i32 = arith.constant 0 : i32
    %0 = arith.cmpi eq, %arg1, %c0_i32 : i32
    %1 = arith.extui %0 : i1 to i32
    %c0_i32_0 = arith.constant 0 : i32
    %2 = arith.cmpi ne, %1, %c0_i32_0 : i32
    scf.if %2 {
      %cst_15 = arith.constant 0.000000e+00 : f32
      %21 = vector.broadcast %cst_15 : f32 to vector<8x128xf32>
      %c0_16 = arith.constant 0 : index
      %c0_17 = arith.constant 0 : index
      %22 = vector.load %arg9[%c0_16, %c0_17] : memref<8x128xf32, #tpu.memory_space<vmem>>, vector<8x128xf32>
      tpu.vector_store %arg9[%c0_16, %c0_17], %21 {strides = array<i32>} : memref<8x128xf32, #tpu.memory_space<vmem>>, vector<8x128xf32>,
      %cst_18 = arith.constant 0.000000e+00 : f32
      %23 = vector.broadcast %cst_18 : f32 to vector<8x1xf32>
      %c0_19 = arith.constant 0 : index
      %c0_20 = arith.constant 0 : index
      %24 = vector.load %arg10[%c0_19, %c0_20] : memref<8x1xf32, #tpu.memory_space<vmem>>, vector<8x1xf32>
      tpu.vector_store %arg10[%c0_19, %c0_20], %23 {strides = array<i32>} : memref<8x1xf32, #tpu.memory_space<vmem>>, vector<8x1xf32>,
    } else {
    }
    %c0 = arith.constant 0 : index
    %c0_1 = arith.constant 0 : index
    %c0_2 = arith.constant 0 : index
    %3 = vector.load %arg2[%c0, %c0_1, %c0_2] : memref<8x128x128xbf16, #tpu.memory_space<vmem>>, vector<8x128x128xbf16>
    %4 = arith.extf %3 : vector<8x128x128xbf16> to vector<8x128x128xf32>
    %c0_3 = arith.constant 0 : index
    %c0_4 = arith.constant 0 : index
    %5 = vector.load %arg3[%c0_3, %c0_4] : memref<8x128xf32, #tpu.memory_space<vmem>>, vector<8x128xf32>
    %c0_5 = arith.constant 0 : index
    %c0_6 = arith.constant 0 : index
    %6 = vector.load %arg9[%c0_5, %c0_6] : memref<8x128xf32, #tpu.memory_space<vmem>>, vector<8x128xf32>
    %7 = vector.shape_cast %5 : vector<8x128xf32> to vector<8x128x1xf32>
    %8 = vector.broadcast %7 : vector<8x128x1xf32> to vector<8x128x128xf32>
    %9 = arith.mulf %4, %8 : vector<8x128x128xf32>
    %cst = arith.constant dense<0.000000e+00> : vector<8x128xf32>
    %10 = vector.multi_reduction <add>, %9, %cst [1] : vector<8x128x128xf32> to vector<8x128xf32>
    %11 = arith.addf %6, %10 : vector<8x128xf32>
    %c0_7 = arith.constant 0 : index
    %c0_8 = arith.constant 0 : index
    %12 = vector.load %arg9[%c0_7, %c0_8] : memref<8x128xf32, #tpu.memory_space<vmem>>, vector<8x128xf32>
    tpu.vector_store %arg9[%c0_7, %c0_8], %11 {strides = array<i32>} : memref<8x128xf32, #tpu.memory_space<vmem>>, vector<8x128xf32>,
    %c0_9 = arith.constant 0 : index
    %c0_10 = arith.constant 0 : index
    %13 = vector.load %arg10[%c0_9, %c0_10] : memref<8x1xf32, #tpu.memory_space<vmem>>, vector<8x1xf32>
    %cst_11 = arith.constant dense<0.000000e+00> : vector<8xf32>
    %14 = vector.multi_reduction <add>, %5, %cst_11 [1] : vector<8x128xf32> to vector<8xf32>
    %15 = vector.shape_cast %14 : vector<8xf32> to vector<8x1xf32>
    %16 = arith.addf %13, %15 : vector<8x1xf32>
    %c0_12 = arith.constant 0 : index
    %c0_13 = arith.constant 0 : index
    %17 = vector.load %arg10[%c0_12, %c0_13] : memref<8x1xf32, #tpu.memory_space<vmem>>, vector<8x1xf32>
    tpu.vector_store %arg10[%c0_12, %c0_13], %16 {strides = array<i32>} : memref<8x1xf32, #tpu.memory_space<vmem>>, vector<8x1xf32>,
    %c1_i32 = arith.constant 1 : i32
    %18 = arith.cmpi eq, %arg1, %c1_i32 : i32
    %19 = arith.extui %18 : i1 to i32
    %c0_i32_14 = arith.constant 0 : i32
    %20 = arith.cmpi ne, %19, %c0_i32_14 : i32
    scf.if %20 {
      %c0_15 = arith.constant 0 : index
      %c0_16 = arith.constant 0 : index
      %21 = vector.load %arg10[%c0_15, %c0_16] : memref<8x1xf32, #tpu.memory_space<vmem>>, vector<8x1xf32>
      %cst_17 = arith.constant 1.000000e+00 : f32
      %22 = vector.broadcast %cst_17 : f32 to vector<8x1xf32>
      %23 = arith.maximumf %21, %22 : vector<8x1xf32>
      %c0_18 = arith.constant 0 : index
      %c0_19 = arith.constant 0 : index
      %24 = vector.load %arg9[%c0_18, %c0_19] : memref<8x128xf32, #tpu.memory_space<vmem>>, vector<8x128xf32>
      %25 = tpu.reciprocal %23 : vector<8x1xf32> -> vector<8x1xf32>
      %26 = vector.broadcast %25 : vector<8x1xf32> to vector<8x128xf32>
      %27 = arith.mulf %24, %26 : vector<8x128xf32>
      %c0_20 = arith.constant 0 : index
      %c0_21 = arith.constant 0 : index
      %28 = vector.load %arg4[%c0_20, %c0_21] : memref<128x384xf32, #tpu.memory_space<vmem>>, vector<128x384xf32>
      %cst_22 = arith.constant dense<0.000000e+00> : vector<8x384xf32>
      %29 = tpu.matmul %27, %28, %cst_22 {dimension_numbers = #tpu.dot_dimension_numbers<[1], [0], [0], [1], [0, 0, 1, 1], [], []>} : vector<8x128xf32>, vector<128x384xf32>, vector<8x384xf32> -> vector<8x384xf32>
      %c0_23 = arith.constant 0 : index
      %c0_24 = arith.constant 0 : index
      %30 = vector.load %arg5[%c0_23, %c0_24] : memref<1x384xf32, #tpu.memory_space<vmem>>, vector<1x384xf32>
      %31 = vector.broadcast %30 : vector<1x384xf32> to vector<8x384xf32>
      %32 = arith.addf %29, %31 : vector<8x384xf32>
      %c0_25 = arith.constant 0 : index
      %c0_26 = arith.constant 0 : index
      %33 = vector.load %arg6[%c0_25, %c0_26] : memref<384x128xf32, #tpu.memory_space<vmem>>, vector<384x128xf32>
      %cst_27 = arith.constant dense<0.000000e+00> : vector<8x128xf32>
      %34 = tpu.matmul %32, %33, %cst_27 {dimension_numbers = #tpu.dot_dimension_numbers<[1], [0], [0], [1], [0, 0, 1, 1], [], []>} : vector<8x384xf32>, vector<384x128xf32>, vector<8x128xf32> -> vector<8x128xf32>
      %c0_28 = arith.constant 0 : index
      %c0_29 = arith.constant 0 : index
      %35 = vector.load %arg7[%c0_28, %c0_29] : memref<1x128xf32, #tpu.memory_space<vmem>>, vector<1x128xf32>
      %36 = vector.broadcast %35 : vector<1x128xf32> to vector<8x128xf32>
      %37 = arith.addf %34, %36 : vector<8x128xf32>
      %c0_30 = arith.constant 0 : index
      %c0_31 = arith.constant 0 : index
      %38 = vector.load %arg8[%c0_30, %c0_31] : memref<8x128xf32, #tpu.memory_space<vmem>>, vector<8x128xf32>
      tpu.vector_store %arg8[%c0_30, %c0_31], %37 {strides = array<i32>} : memref<8x128xf32, #tpu.memory_space<vmem>>, vector<8x128xf32>,
    } else {
    }
    return
  }
  func.func @transform_0(%arg0: i32, %arg1: i32) -> (i32, i32, i32) {
    %c0_i32 = arith.constant 0 : i32
    %c0_i32_0 = arith.constant 0 : i32
    return %arg0, %arg1, %c0_i32 : i32, i32, i32
  }
  func.func @transform_1(%arg0: i32, %arg1: i32) -> (i32, i32) {
    %c0_i32 = arith.constant 0 : i32
    return %arg0, %arg1 : i32, i32
  }
  func.func @transform_2(%arg0: i32, %arg1: i32) -> (i32, i32) {
    %c0_i32 = arith.constant 0 : i32
    %c0_i32_0 = arith.constant 0 : i32
    %c0_i32_1 = arith.constant 0 : i32
    return %c0_i32, %c0_i32_0 : i32, i32
  }
  func.func @transform_3(%arg0: i32, %arg1: i32) -> (i32, i32) {
    %c0_i32 = arith.constant 0 : i32
    %c0_i32_0 = arith.constant 0 : i32
    %c0_i32_1 = arith.constant 0 : i32
    return %c0_i32, %c0_i32_0 : i32, i32
  }
  func.func @transform_4(%arg0: i32, %arg1: i32) -> (i32, i32) {
    %c0_i32 = arith.constant 0 : i32
    %c0_i32_0 = arith.constant 0 : i32
    %c0_i32_1 = arith.constant 0 : i32
    return %c0_i32, %c0_i32_0 : i32, i32
  }
  func.func @transform_5(%arg0: i32, %arg1: i32) -> (i32, i32) {
    %c0_i32 = arith.constant 0 : i32
    %c0_i32_0 = arith.constant 0 : i32
    %c0_i32_1 = arith.constant 0 : i32
    return %c0_i32, %c0_i32_0 : i32, i32
  }
  func.func @transform_6(%arg0: i32, %arg1: i32) -> (i32, i32) {
    %c0_i32 = arith.constant 0 : i32
    %c0_i32_0 = arith.constant 0 : i32
    return %arg0, %c0_i32 : i32, i32
  }
}

</mosaic_0001>

<bundles_post_ra>
// kernel: _ensemble_call.1
= control target key start
LH: loop header
LB: loop body
LE: loop exit
PB: predicated region body
PF: predicated region fallthrough
CT: control target
= control target key end

     0   :  { %s3663_s0 = inlined_call_operand.hbm [shape: bf16[8,256,128], index: 0, kind: input, shape index: {}]   ;;  %s3664_s1 = inlined_call_operand.hbm [shape: f32[8,256], index: 1, kind: input, shape index: {}]   ;;  %s3665_s2 = inlined_call_operand.hbm [shape: f32[128,384], index: 2, kind: input, shape index: {}]   ;;  %s3666_s3 = inlined_call_operand.hbm [shape: f32[1,384], index: 3, kind: input, shape index: {}]   ;;  %s3667_s4 = inlined_call_operand.hbm [shape: f32[384,128], index: 4, kind: input, shape index: {}]   ;;  %s3668_s5 = inlined_call_operand.vmem [shape: f32[1,128], index: 5, kind: input, shape index: {}]   ;;  %s3669_s6 = inlined_call_operand.hbm [shape: f32[8,128], index: 6, kind: output, shape index: {}]  }
   0x1   :  { %3681 = sst [smem:[#allocation37_spill]] %s3663_s0 }
   0x2   :  { %3682 = sst [smem:[#allocation38_spill]] %s3666_s3 }
   0x3   :  { %11 = vsyncpa [#allocation5], 0 }
   0x4   :  { %13 = vsyncpa [#allocation5 + $0x1], 0 }
   0x5   :  { %14 = vsyncpa [#allocation8], 0 }
   0x6   :  { %16 = vsyncpa [#allocation8 + $0x1], 0 }
   0x7   :  { %17 = vsyncpa [#allocation11], 0 }
   0x8   :  { %18 = vsyncpa [#allocation6], 0  ;;  %s2993_s21 = smov 0   ;;  %s2995_s22 = smov 0  }
   0x9   :  { %s2997_s23 = smov 0   ;;  %s2999_s24 = smov 0  }
   0xa   :  { %s3001_s25 = smov 0   ;;  %s3003_s26 = smov 0  }
   0xb LB: > { %s3022_s27 = sadd.s32 4294967295, %s2940_s26   ;;  %s33_s28 = sadd.s32 1, %s2936_s25  ;;  %s2940_s26 = sphi %s3003_s26, %s24_s26   ;;  %s2936_s25 = sphi %s3001_s25, %s3725_s25   ;;  %s2932_s24 = sphi %s2999_s24, %s3724_s24   ;;  %s2928_s23 = sphi %s2997_s23, %s3723_s23   ;;  %s2924_s22 = sphi %s2995_s22, %s3722_s22   ;;  %s2920_s21 = sphi %s2993_s21, %s3721_s21  }
   0xc   : > { %p34_p0 = scmp.ge.s32.totalorder %s33_s28, 2  ;;  %s45_s29 = sadd.s32 1, %s2928_s23 }
   0xd   : > { %p52_p1 = scmp.ne.s32.totalorder %s2928_s23, %s2924_s22  ;;  %p53_p2 = scmp.eq.s32.totalorder %s2940_s26, 0 }
   0xe   : > { %s3727_s28 = smov (%p34_p0, %s33_s28), 0  ;;  %p58_p4 = scmp.ne.s32.totalorder %s2924_s22, %s2920_s21 }
   0xf   : > { %3683 = sst [smem:[#allocation22_spill]] %s3727_s28  ;;  %p3031_p3 = por %p53_p2, %p52_p1 }
  0x10   : > { %s41_s7 = ssub.s32 %s2936_s25, %s3727_s28  ;;  %p59_p5 = scmp.eq.s32.totalorder %s3022_s27, 0 }
  0x11   : > { %p43_p6 = scmp.eq.s32.totalorder %s41_s7, 0  ;;  %p2152_p7 = scmp.ge.s32.totalorder %s2940_s26, 1 }
  0x12   : > { %p3042_p8 = por %p59_p5, %p58_p4  ;;  %p207_p9 = scmp.lt.s32.totalorder %s2940_s26, 3 }
  0x13   : > { %s3048_s9 = scalar_select %p43_p6, %s2928_s23, %s45_s29  }
  0x14   : > { %p3050_p10 = pnand %p2152_p7, %p207_p9  ;;  %s3687_s3 = sld [smem:[#allocation38_spill]] }
  0x15   : > { %s2942_s14 = smov [#allocation10]   ;;  %s218_s19 = sshll.u32 %s3665_s2, 4  ;;  %s219_s19 = int_to_ptr.hbm [resolvable:$true] %s218_s19 }
  0x16   : > { %p2523_p11 = pneg %p3050_p10  ;;  %s235_s15 = sshll.u32 %s2942_s14, 4  ;;  %s236_s15 = int_to_ptr.vmem [resolvable:$true] %s235_s15 }
  0x17   : > { %s2943_s20 = smov [#allocation9]   ;;  %s244_s11 = sshll.u32 %s3667_s4, 4  ;;  %s245_s11 = int_to_ptr.hbm [resolvable:$true] %s244_s11 }
  0x18   : > { %p3061_p12 = pnand %p2523_p11, %p59_p5  ;;  %s220_s21 = sshll.u32 %s2943_s20, 4  ;;  %s221_s21 = int_to_ptr.vmem [resolvable:$true] %s220_s21 }
  0x19   : > { %s2944_s12 = smov 384   ;;  %s2945_s14 = smov 24  }
  0x1a   : > { %s233_s13 = sshll.u32 %s3687_s3, 4  ;;  %s2946_s3 = smov [#allocation12]   ;;  %s234_s13 = int_to_ptr.hbm [resolvable:$true] %s233_s13 }
  0x1b   : > { %2529 = dma.hbm_to_vmem [thread:$0]  (!%p3061_p12), %s234_s13, 48, %s236_s15, [#allocation11]  }
  0x1c   : > { %2526 = dma.hbm_to_vmem [thread:$0]  (!%p3061_p12), %s219_s19, 6144, %s221_s21, [#allocation8], %s2944_s12, %s2944_s12, %s2945_s14  }
  0x1d   : > { %s246_s28 = sshll.u32 %s2946_s3, 4  ;;  %s2947_s17 = smov 128   ;;  %s247_s28 = int_to_ptr.vmem [resolvable:$true] %s246_s28 }
  0x1e   : > { %s2948_s18 = smov 8   ;;  %p2156_p13 = scmp.ge.s32.totalorder %s2940_s26, 2 }
  0x1f   : > { %2532 = dma.hbm_to_vmem [thread:$0]  (!%p3061_p12), %s245_s11, 6144, %s247_s28, [#allocation11], %s2947_s17, %s2947_s17, %s2948_s18  }
  0x20   : > { %259 = sbr.rel (%p2156_p13) target bundleno = 56 (0x38), region = 32 }
  0x25   : > { %s3079_s13 = sand.u32 1, %s2928_s23   ;;  %s2176_s15 = sshll.u32 %s2936_s25, 6 }
  0x26   : > { %s2157_s19 = sshll.u32 %s3079_s13, 9  ;;  %s3689_s0 = sld [smem:[#allocation37_spill]] }
  0x27   : > { %s2502_s28 = scalar_select %p3031_p3, [#allocation0], [#allocation16] }
  0x28   : > { %s267_s29 = scalar_lea.vmem [#allocation4], %s2157_s19  ;;  %s2949_s12 = smov 2048  }
  0x29   : > { %s290_s7 = sshll.u32 %s267_s29, 4  ;;  %s280_s11 = sld [smem:[%s2502_s28]]   ;;  %s291_s7 = int_to_ptr.vmem [resolvable:$true] %s290_s7 }
  0x2a   : > { %2503 = sst [smem:[#allocation15]] (%p3031_p3), %s2949_s12  ;;  %s2950_s14 = smov 1024  }
  0x2b   : > { %2504 = sst [smem:[#allocation15 + $0x1]] (%p3031_p3), %s2950_s14  ;;  %s2951_s17 = smov 16  }
  0x2c   : > { %s275_s16 = scalar_lea.hbm %s3689_s0, %s2176_s15  ;;  %2505 = sst [smem:[#allocation15 + $0x2]] (%p3031_p3), %s2951_s17 }
  0x2d   : > { %s288_s21 = sshll.u32 %s275_s16, 4  ;;  %s2952_s18 = smov 64   ;;  %s289_s21 = int_to_ptr.hbm [resolvable:$true] %s288_s21 }
  0x2e   : > { %2506 = sst [smem:[#allocation15 + $0x3]] (%p3031_p3), %s2952_s18  ;;  %s2953_s3 = smov 4  }
  0x2f   : > { %s2160_s15 = sshll.u32 %s280_s11, 26  ;;  %2507 = sst [smem:[#allocation15 + $0x4]] (%p3031_p3), %s2952_s18 }
  0x30   : > { %s2161_s19 = sadd.s32 134217728, %s2160_s15  ;;  %2508 = sst [smem:[#allocation15 + $0x5]] (%p3031_p3), %s2953_s3 }
  0x31   : > { %s264_s20 = scalar_lea.sflag [#allocation5], %s3079_s13  ;;  %s2954_s16 = smov [#allocation14]  }
  0x32   : > { %2509 = dma.general (%p3031_p3), %s289_s21, 8192, %s291_s7, %s264_s20, %s2954_s16, [#allocation15], %s2161_s19, 0  }
  0x33   : > { %s313_s28 = sand.u32 1, %s2940_s26   ;;  %s2162_s29 = sshll.u32 %s3079_s13, 3 }
  0x34   : > { %s2163_s12 = sshll.u32 %s2936_s25, 3  ;;  %s317_s14 = scalar_lea.vmem [#allocation7], %s2162_s29 }
  0x35   : > { %s327_s17 = sshll.u32 %s317_s14, 4  ;;  %s323_s18 = scalar_lea.hbm %s3664_s1, %s2163_s12  ;;  %s328_s17 = int_to_ptr.vmem [resolvable:$true] %s327_s17 }
  0x36   : > { %s325_s15 = sshll.u32 %s323_s18, 4  ;;  %s314_s3 = scalar_lea.sflag [#allocation8], %s313_s28  ;;  %s326_s15 = int_to_ptr.hbm [resolvable:$true] %s325_s15 }
  0x37   : > { %2510 = dma.hbm_to_vmem [thread:$0]  (%p3031_p3), %s326_s15, 128, %s328_s17, %s314_s3  }
  0x38 PF: > { %336 = sbr.rel (%p3050_p10) target bundleno = 1443 (0x5a3), region = 44 }
  0x3d   : > { %s338_s13 = sand.u32 1, %s2924_s22  }
  0x3e   : > { %s2165_s21 = sshll.u32 %s338_s13, 9  ;;  %s339_s7 = scalar_lea.sflag [#allocation5], %s338_s13 }
  0x3f   : > { %s3114_s19 = scalar_lea.vmem [#allocation4], %s2165_s21 }
  0x40   : > { %2899 = dma.done.wait (%p3042_p8), %s339_s7, 8192  }
  0x41   : > { %2901 = vsyncadd (%p3042_p8), %s339_s7, 4294959104  ;;  %s348_s0 = sand.u32 1, %s3022_s27   ;;  %s2166_s30 = sshll.u32 %s338_s13, 3 }
  0x42   : > { %s349_s20 = scalar_lea.sflag [#allocation8], %s348_s0  ;;  %s352_s16 = scalar_lea.vmem [#allocation7], %s2166_s30 }
  0x43   : > { %2903 = dma.done.wait (%p3042_p8), %s349_s20, 128  }
  0x44   : > { %2905 = vsyncadd (%p3042_p8), %s349_s20, 4294967168 }
  0x45   : > { %2907 = dma.done.wait (%p59_p5), [#allocation8], 6144  }
  0x46   : > { %2909 = vsyncadd (%p59_p5), [#allocation8], 4294961152 }
  0x47   : > { %2911 = dma.done.wait (%p59_p5), [#allocation11], 6192  }
  0x48   : > { %2913 = vsyncadd (%p59_p5), [#allocation11], 4294961104  ;;  %p2170_p0 = scmp.ne.s32.totalorder %s2932_s24, 0 }
  0x4a   : > { %402 = sbr.rel (%p2170_p0) target bundleno = 82 (0x52), region = 68 }
  0x4f   : > { %vm404_vm0 = vcmask 7168   ;;  %v2955_v0 = vmov 0.0  }
  0x50   : > { %403 = vst [vmem:[#allocation2] sm:$0xff] %v2955_v0 }
  0x51   : > { %405 = vst.msk [vmem:[#allocation3] sm:$0xff] %vm404_vm0, %v2955_v0 }
  0x52 PF: > { %v665_v1 = vlaneseq  ;;  %v3143_v5 = vld [vmem:[%s352_s16] sm:$0xff]  ;;  %v2442_v0 = vld [vmem:[%s3114_s19 + $0x50] sm:$0xff]   ;;  %vm1744_vm1 = vcmask 1041409   ;;  %vm1746_vm2 = vcmask 1042434   ;;  %vm1748_vm3 = vcmask 1043459   ;;  %p2171_p1 = scmp.ne.s32.totalorder %s2932_s24, 1 }
  0x53   : > { %v3148_v6 = vperm.slane %v3143_v5, 0  ;;  %v3154_v7 = vperm.slane %v3143_v5, 3  ;;  %v3208_v17 = vperm.slane %v3143_v5, 4  ;;  %v3226_v20 = vperm.slane %v3143_v5, 1  ;;  %v2440_v42 = vld [vmem:[%s3114_s19 + $0x40] sm:$0xff]   ;;  %v2441_v61 = vld [vmem:[%s3114_s19 + $0x48] sm:$0xff]  }
  0x54   : > { %v3134_v2 = vshrl.u32 %v665_v1, 7  ;;  %v3238_v21 = vperm.slane %v3143_v5, 5  ;;  %v3294_v34 = vperm.slane %v3143_v5, 6  ;;  %v3302_v37 = vperm.slane %v3143_v5, 2 }
  0x55   : > { %v2212_v43 = vunpack.c.h.bf16 %v2440_v42  ;;  %v2211_v46 = vunpack.c.l.bf16 %v2440_v42  ;;  %v3355_v56 = vperm.slane %v3143_v5, 7  ;;  %v2215_v62 = vunpack.c.l.bf16 %v2441_v61 }
  0x56   : > { %2605 = vset.pattern.permute.xlu0 %v3134_v2  ;;  %v3138_v3 = vadd.s32 16, %v3134_v2  ;;  %v3141_v4 = vadd.s32 32, %v3134_v2  ;;  %v3157_v8 = vadd.s32 24, %v3134_v2  ;;  %v3161_v9 = vadd.s32 40, %v3134_v2  ;;  %3693 = vst [vmem:[#allocation26_spill] sm:$0xff] %v3294_v34 }
  0x57   : > { %v3169_v10 = vadd.s32 48, %v3134_v2  ;;  %v3172_v11 = vadd.s32 56, %v3134_v2  ;;  %v3178_v12 = vadd.s32 80, %v3134_v2  ;;  %v3184_v13 = vadd.s32 72, %v3134_v2  ;;  %3698 = vst [vmem:[#allocation31_spill] sm:$0xff] %v3355_v56 }
  0x58   : > { %3690 = vst [vmem:[#allocation23_spill] sm:$0xff] %v3141_v4  ;;  %2606 = vset.pattern.permute.xlu1 %v3138_v3  ;;  %2608 = vset.pattern.permute.xlu2 %v3141_v4  ;;  %v3190_v14 = vadd.s32 120, %v3134_v2  ;;  %v3196_v15 = vadd.s32 88, %v3134_v2  ;;  %v3199_v16 = vadd.s32 96, %v3134_v2  ;;  %v3211_v18 = vadd.s32 112, %v3134_v2 }
  0x59   : > { %3691 = vst [vmem:[#allocation24_spill] sm:$0xff] %v3184_v13  ;;  %v3220_v19 = vadd.s32 8, %v3134_v2  ;;  %v3244_v22 = vadd.s32 64, %v3134_v2  ;;  %v3256_v23 = vadd.s32 104, %v3134_v2  ;;  %v2216_v1 = vunpack.c.h.bf16 %v2441_v61 }
  0x5a   : > { %3692 = vst [vmem:[#allocation25_spill] sm:$0xff] %v3211_v18  ;;  %vm1750_vm4 = vcmask 1044484   ;;  %vm1752_vm5 = vcmask 1045509   ;;  %vm1754_vm6 = vcmask 1046534   ;;  %vm1765_vm7 = vcmask 7168  }
  0x5b   : > { %vm1756_vm8 = vcmask 1047559  }
  0x5e   : > { %669 = vperm.xlu0 %2605, %v3148_v6  }
  0x60   : > { %681 = vperm.xlu1 %2606, %v3148_v6   ;;  %693 = vperm.xlu2 %2608, %v3148_v6  }
  0x66   : > { %960 = vperm.xlu0 %2605, %v3154_v7  }
  0x68   : > { %2607 = vset.pattern.permute.xlu1 %v3157_v8  ;;  %2609 = vset.pattern.permute.xlu2 %v3161_v9 }
  0x6e   : > { %2648 = vset.pattern.permute.xlu0 %v3161_v9 }
  0x70   : > { %687 = vperm.xlu1 %2607, %v3148_v6   ;;  %699 = vperm.xlu2 %2609, %v3148_v6  }
  0x76   : > { %990 = vperm.xlu0 %2648, %v3154_v7  }
  0x78   : > { %2610 = vset.pattern.permute.xlu1 %v3169_v10  ;;  %2611 = vset.pattern.permute.xlu2 %v3172_v11 }
  0x7e   : > { %2653 = vset.pattern.permute.xlu0 %v3178_v12 }
  0x80   : > { %705 = vperm.xlu1 %2610, %v3148_v6   ;;  %711 = vperm.xlu2 %2611, %v3148_v6  }
  0x86   : > { %1020 = vperm.xlu0 %2653, %v3154_v7  }
  0x88   : > { %2612 = vset.pattern.permute.xlu1 %v3184_v13  ;;  %2613 = vset.pattern.permute.xlu2 %v3178_v12 }
  0x8e   : > { %2658 = vset.pattern.permute.xlu0 %v3190_v14 }
  0x90   : > { %723 = vperm.xlu1 %2612, %v3148_v6   ;;  %729 = vperm.xlu2 %2613, %v3148_v6  }
  0x96   : > { %1050 = vperm.xlu0 %2658, %v3154_v7  }
  0x98   : > { %2614 = vset.pattern.permute.xlu1 %v3196_v15  ;;  %2615 = vset.pattern.permute.xlu2 %v3199_v16 }
  0x9e   : > { %2663 = vset.pattern.permute.xlu0 %v3141_v4 }
  0xa0   : > { %735 = vperm.xlu1 %2614, %v3148_v6   ;;  %741 = vperm.xlu2 %2615, %v3148_v6  }
  0xa6   : > { %1081 = vperm.xlu0 %2663, %v3208_v17  }
  0xa8   : > { %2616 = vset.pattern.permute.xlu1 %v3211_v18  ;;  %2617 = vset.pattern.permute.xlu2 %v3190_v14 }
  0xae   : > { %2668 = vset.pattern.permute.xlu0 %v3184_v13 }
  0xb0   : > { %753 = vperm.xlu1 %2616, %v3148_v6   ;;  %759 = vperm.xlu2 %2617, %v3148_v6  }
  0xb6   : > { %1111 = vperm.xlu0 %2668, %v3208_v17  }
  0xb8   : > { %2618 = vset.pattern.permute.xlu1 %v3134_v2  ;;  %2619 = vset.pattern.permute.xlu2 %v3220_v19 }
  0xba   : > { %v3261_v24 = vpop.permute.xlu2 %693 }
  0xbe   : > { %2673 = vset.pattern.permute.xlu0 %v3211_v18 }
  0xc0   : > { %766 = vperm.xlu1 %2618, %v3226_v20   ;;  %772 = vperm.xlu2 %2619, %v3226_v20  }
  0xc6   : > { %1141 = vperm.xlu0 %2673, %v3208_v17  }
  0xc8   : > { %2620 = vset.pattern.permute.xlu1 %v3157_v8  ;;  %2621 = vset.pattern.permute.xlu2 %v3141_v4 }
  0xca   : > { %v3268_v26 = vpop.permute.xlu2 %699 }
  0xce   : > { %2678 = vset.pattern.permute.xlu0 %v3157_v8 }
  0xd0   : > { %784 = vperm.xlu1 %2620, %v3226_v20   ;;  %790 = vperm.xlu2 %2621, %v3226_v20   ;;  %v3271_v27 = vpop.permute.xlu0 %669 }
  0xd2   : > { %v3266_v25 = vpop.permute.xlu1 %681 }
  0xd6   : > { %1172 = vperm.xlu0 %2678, %v3238_v21  }
  0xd8   : > { %2622 = vset.pattern.permute.xlu1 %v3161_v9  ;;  %2623 = vset.pattern.permute.xlu2 %v3169_v10  ;;  %v3282_v30 = vpop.permute.xlu0 %960 }
  0xda   : > { %v3277_v29 = vpop.permute.xlu2 %711 }
  0xde   : > { %2679 = vset.pattern.permute.xlu0 %v3244_v22 }
  0xe0   : > { %796 = vperm.xlu1 %2622, %v3226_v20   ;;  %802 = vperm.xlu2 %2623, %v3226_v20  }
  0xe2   : > { %v3275_v28 = vpop.permute.xlu1 %687 }
  0xe6   : > { %717 = vperm.xlu0 %2679, %v3148_v6  }
  0xe8   : > { %2624 = vset.pattern.permute.xlu1 %v3244_v22  ;;  %2625 = vset.pattern.permute.xlu2 %v3184_v13  ;;  %v3296_v35 = vpop.permute.xlu0 %990 }
  0xea   : > { %v3286_v32 = vpop.permute.xlu2 %729 }
  0xee   : > { %1202 = vperm.xlu0 %2679, %v3238_v21  }
  0xf0   : > { %814 = vperm.xlu1 %2624, %v3226_v20   ;;  %820 = vperm.xlu2 %2625, %v3226_v20  }
  0xf2   : > { %v3284_v31 = vpop.permute.xlu1 %705 }
  0xf6   : > { %2684 = vset.pattern.permute.xlu0 %v3256_v23 }
  0xf8   : > { %2626 = vset.pattern.permute.xlu1 %v3178_v12  ;;  %2627 = vset.pattern.permute.xlu2 %v3196_v15  ;;  %v3308_v39 = vpop.permute.xlu0 %1020 }
  0xfa   : > { %v3298_v36 = vpop.permute.xlu2 %741 }
  0xfe   : > { %747 = vperm.xlu0 %2684, %v3148_v6  }
 0x100   : > { %826 = vperm.xlu1 %2626, %v3226_v20   ;;  %832 = vperm.xlu2 %2627, %v3226_v20  }
 0x102   : > { %v3291_v33 = vpop.permute.xlu1 %723 }
 0x106   : > { %1232 = vperm.xlu0 %2684, %v3238_v21  }
 0x108   : > { %2628 = vset.pattern.permute.xlu1 %v3256_v23  ;;  %2629 = vset.pattern.permute.xlu2 %v3211_v18  ;;  %v3319_v45 = vpop.permute.xlu0 %1050 }
 0x10a   : > { %v3310_v40 = vpop.permute.xlu2 %759 }
 0x10e   : > { %2689 = vset.pattern.permute.xlu0 %v3138_v3 }
 0x110   : > { %844 = vperm.xlu1 %2628, %v3226_v20   ;;  %850 = vperm.xlu2 %2629, %v3226_v20  }
 0x112   : > { %v3306_v38 = vpop.permute.xlu1 %735 }
 0x116   : > { %778 = vperm.xlu0 %2689, %v3226_v20  }
 0x118   : > { %2630 = vset.pattern.permute.xlu1 %v3190_v14  ;;  %2631 = vset.pattern.permute.xlu2 %v3134_v2  ;;  %v3325_v51 = vpop.permute.xlu0 %1081 }
 0x119   : > { %3694 = vst [vmem:[#allocation27_spill] sm:$0xff] %v3325_v51 }
 0x11a   : > { %v773_v44 = vpop.permute.xlu2 %772 }
 0x11b   : > { %v1457_v47 = vmul.f32 %v2212_v43, %v773_v44  ;;  %v2443_v43 = vld [vmem:[%s3114_s19 + $0x58] sm:$0xff]  }
 0x11e   : > { %1263 = vperm.xlu0 %2689, %v3294_v34  }
 0x120   : > { %856 = vperm.xlu1 %2630, %v3226_v20   ;;  %863 = vperm.xlu2 %2631, %v3302_v37  }
 0x122   : > { %v3315_v41 = vpop.permute.xlu1 %753 }
 0x126   : > { %2694 = vset.pattern.permute.xlu0 %v3172_v11 }
 0x128   : > { %2632 = vset.pattern.permute.xlu1 %v3138_v3  ;;  %2633 = vset.pattern.permute.xlu2 %v3157_v8  ;;  %v3331_v52 = vpop.permute.xlu0 %1111 }
 0x129   : > { %3695 = vst [vmem:[#allocation28_spill] sm:$0xff] %v3331_v52 }
 0x12a   : > { %v791_v63 = vpop.permute.xlu2 %790 }
 0x12e   : > { %808 = vperm.xlu0 %2694, %v3226_v20  }
 0x130   : > { %875 = vperm.xlu1 %2632, %v3302_v37   ;;  %881 = vperm.xlu2 %2633, %v3302_v37  }
 0x132   : > { %v767_v48 = vpop.permute.xlu1 %766 }
 0x133   : > { %v1456_v49 = vmul.f32 %v2211_v46, %v767_v48  ;;  %v2220_v46 = vunpack.c.h.bf16 %v2442_v0 }
 0x135   : > { %v1589_v50 = vadd.f32 %v1457_v47, %v1456_v49 }
 0x136   : > { %1293 = vperm.xlu0 %2694, %v3294_v34  }
 0x138   : > { %2634 = vset.pattern.permute.xlu1 %v3141_v4  ;;  %2635 = vset.pattern.permute.xlu2 %v3161_v9  ;;  %v3336_v53 = vpop.permute.xlu0 %1141 }
 0x139   : > { %3696 = vst [vmem:[#allocation29_spill] sm:$0xff] %v3336_v53  ;;  %v2436_v53 = vld [vmem:[%s3114_s19 + $0x20] sm:$0xff]  }
 0x13e   : > { %2699 = vset.pattern.permute.xlu0 %v3199_v16 }
 0x140   : > { %887 = vperm.xlu1 %2634, %v3302_v37   ;;  %893 = vperm.xlu2 %2635, %v3302_v37  }
 0x142   : > { %v785_v60 = vpop.permute.xlu1 %784 }
 0x143   : > { %v1459_v44 = vmul.f32 %v2216_v1, %v785_v60  ;;  %v2224_v1 = vunpack.c.h.bf16 %v2443_v43 }
 0x146   : > { %838 = vperm.xlu0 %2699, %v3226_v20   ;;  %v2219_v20 = vunpack.c.l.bf16 %v2442_v0  ;;  %v2444_v0 = vld [vmem:[%s3114_s19 + $0x60] sm:$0xff]  }
 0x148   : > { %2636 = vset.pattern.permute.xlu1 %v3172_v11  ;;  %2637 = vset.pattern.permute.xlu2 %v3244_v22  ;;  %v3342_v54 = vpop.permute.xlu0 %1172  ;;  %v1460_v49 = vmul.f32 %v2219_v20, %v791_v63  ;;  %v2227_v20 = vunpack.c.l.bf16 %v2444_v0 }
 0x149   : > { %3697 = vst [vmem:[#allocation30_spill] sm:$0xff] %v3342_v54  ;;  %v803_v54 = vpop.permute.xlu2 %802 }
 0x14e   : > { %1323 = vperm.xlu0 %2699, %v3294_v34  }
 0x150   : > { %905 = vperm.xlu1 %2636, %v3302_v37   ;;  %911 = vperm.xlu2 %2637, %v3302_v37  }
 0x152   : > { %v797_v48 = vpop.permute.xlu1 %796 }
 0x153   : > { %v1461_v61 = vmul.f32 %v2220_v46, %v797_v48 }
 0x156   : > { %2704 = vset.pattern.permute.xlu0 %v3220_v19 }
 0x158   : > { %2638 = vset.pattern.permute.xlu1 %v3184_v13  ;;  %2639 = vset.pattern.permute.xlu2 %v3178_v12  ;;  %v3348_v55 = vpop.permute.xlu0 %717 }
 0x15e   : > { %675 = vperm.xlu0 %2704, %v3148_v6  }
 0x160   : > { %917 = vperm.xlu1 %2638, %v3302_v37   ;;  %923 = vperm.xlu2 %2639, %v3302_v37   ;;  %v3357_v57 = vpop.permute.xlu0 %1202 }
 0x161   : > { %3699 = vst [vmem:[#allocation32_spill] sm:$0xff] %v3357_v57 }
 0x162   : > { %v815_v63 = vpop.permute.xlu1 %814 }
 0x166   : > { %869 = vperm.xlu0 %2704, %v3302_v37  }
 0x168   : > { %2640 = vset.pattern.permute.xlu1 %v3199_v16  ;;  %2641 = vset.pattern.permute.xlu2 %v3256_v23 }
 0x16e   : > { %1354 = vperm.xlu0 %2704, %v3355_v56  }
 0x170   : > { %935 = vperm.xlu1 %2640, %v3302_v37   ;;  %941 = vperm.xlu2 %2641, %v3302_v37   ;;  %v3362_v58 = vpop.permute.xlu0 %747 }
 0x176   : > { %2709 = vset.pattern.permute.xlu0 %v3169_v10 }
 0x178   : > { %2642 = vset.pattern.permute.xlu1 %v3211_v18  ;;  %2643 = vset.pattern.permute.xlu2 %v3190_v14  ;;  %v3368_v59 = vpop.permute.xlu0 %1232 }
 0x179   : > { %3700 = vst [vmem:[#allocation33_spill] sm:$0xff] %v3368_v59  ;;  %v2223_v59 = vunpack.c.l.bf16 %v2443_v43 }
 0x17e   : > { %899 = vperm.xlu0 %2709, %v3302_v37  }
 0x180   : > { %947 = vperm.xlu1 %2642, %v3302_v37   ;;  %953 = vperm.xlu2 %2643, %v3302_v37  }
 0x186   : > { %1384 = vperm.xlu0 %2709, %v3355_v56  }
 0x188   : > { %2644 = vset.pattern.permute.xlu1 %v3220_v19  ;;  %v779_v6 = vpop.permute.xlu0 %778  ;;  %2645 = vset.pattern.permute.xlu2 %v3138_v3 }
 0x189   : > { %v1458_v42 = vmul.f32 %v2215_v62, %v779_v6  ;;  %v1462_v62 = vmul.f32 %v2223_v59, %v803_v54  ;;  %v1464_v59 = vmul.f32 %v2227_v20, %v815_v63 }
 0x18b   : > { %v1590_v47 = vadd.f32 %v1589_v50, %v1458_v42  ;;  %v2445_v42 = vld [vmem:[%s3114_s19 + $0x68] sm:$0xff]  }
 0x18d   : > { %v1591_v57 = vadd.f32 %v1590_v47, %v1459_v44  ;;  %v2231_v44 = vunpack.c.l.bf16 %v2445_v42  ;;  %v827_v47 = vpop.permute.xlu1 %826 }
 0x18e   : > { %2714 = vset.pattern.permute.xlu0 %v3196_v15 }
 0x18f   : > { %v1592_v34 = vadd.f32 %v1591_v57, %v1460_v49  ;;  %v821_v57 = vpop.permute.xlu2 %820  ;;  %v2232_v49 = vunpack.c.h.bf16 %v2445_v42 }
 0x190   : > { %966 = vperm.xlu1 %2644, %v3154_v7   ;;  %972 = vperm.xlu2 %2645, %v3154_v7   ;;  %v3382_v50 = vpop.permute.xlu0 %1263 }
 0x191   : > { %v1593_v6 = vadd.f32 %v1592_v34, %v1461_v61  ;;  %3701 = vst [vmem:[#allocation34_spill] sm:$0xff] %v3382_v50 }
 0x193   : > { %v1594_v60 = vadd.f32 %v1593_v6, %v1462_v62  ;;  %v1466_v62 = vmul.f32 %v2231_v44, %v827_v47 }
 0x196   : > { %929 = vperm.xlu0 %2714, %v3302_v37   ;;  %v2228_v37 = vunpack.c.h.bf16 %v2444_v0 }
 0x197   : > { %v833_v61 = vpop.permute.xlu2 %832 }
 0x198   : > { %2646 = vset.pattern.permute.xlu1 %v3157_v8  ;;  %2647 = vset.pattern.permute.xlu2 %v3141_v4  ;;  %v1465_v48 = vmul.f32 %v2228_v37, %v821_v57  ;;  %v1467_v0 = vmul.f32 %v2232_v49, %v833_v61  ;;  %v2446_v57 = vld [vmem:[%s3114_s19 + $0x70] sm:$0xff]  }
 0x199   : > { %v2235_v42 = vunpack.c.l.bf16 %v2446_v57  ;;  %v2236_v37 = vunpack.c.h.bf16 %v2446_v57 }
 0x19e   : > { %1414 = vperm.xlu0 %2714, %v3355_v56  }
 0x1a0   : > { %978 = vperm.xlu1 %2646, %v3154_v7   ;;  %v809_v34 = vpop.permute.xlu0 %808  ;;  %984 = vperm.xlu2 %2647, %v3154_v7  }
 0x1a1   : > { %v1463_v54 = vmul.f32 %v2224_v1, %v809_v34  ;;  %v2447_v34 = vld [vmem:[%s3114_s19 + $0x78] sm:$0xff]  }
 0x1a3   : > { %v1595_v46 = vadd.f32 %v1594_v60, %v1463_v54  ;;  %v845_v60 = vpop.permute.xlu1 %844 }
 0x1a4   : > { %v1469_v47 = vmul.f32 %v2236_v37, %v845_v60  ;;  %v2433_v60 = vld [vmem:[%s3114_s19 + $0x8] sm:$0xff]  }
 0x1a5   : > { %v1596_v43 = vadd.f32 %v1595_v46, %v1464_v59  ;;  %v2239_v59 = vunpack.c.l.bf16 %v2447_v34  ;;  %v851_v46 = vpop.permute.xlu2 %850  ;;  %v2183_v37 = vunpack.c.l.bf16 %v2433_v60 }
 0x1a6   : > { %2723 = vset.pattern.permute.xlu0 %v3190_v14 }
 0x1a7   : > { %v1597_v6 = vadd.f32 %v1596_v43, %v1465_v48  ;;  %v2240_v48 = vunpack.c.h.bf16 %v2447_v34  ;;  %v1470_v61 = vmul.f32 %v2239_v59, %v851_v46 }
 0x1a8   : > { %2649 = vset.pattern.permute.xlu1 %v3169_v10  ;;  %2650 = vset.pattern.permute.xlu2 %v3172_v11  ;;  %v3394_v20 = vpop.permute.xlu0 %1293 }
 0x1a9   : > { %v1598_v1 = vadd.f32 %v1597_v6, %v1466_v62  ;;  %3702 = vst [vmem:[#allocation35_spill] sm:$0xff] %v3394_v20 }
 0x1ab   : > { %v1599_v63 = vadd.f32 %v1598_v1, %v1467_v0  ;;  %v857_v43 = vpop.permute.xlu1 %856 }
 0x1ac   : > { %v1471_v6 = vmul.f32 %v2240_v48, %v857_v43  ;;  %v2184_v48 = vunpack.c.h.bf16 %v2433_v60  ;;  %v2448_v43 = vld [vmem:[%s3114_s19 + $0x80] sm:$0xff]  }
 0x1ad   : > { %v2244_v50 = vunpack.c.h.bf16 %v2448_v43 }
 0x1b0   : > { %996 = vperm.xlu1 %2649, %v3154_v7   ;;  %1002 = vperm.xlu2 %2650, %v3154_v7  }
 0x1b8   : > { %2651 = vset.pattern.permute.xlu1 %v3244_v22  ;;  %v839_v54 = vpop.permute.xlu0 %838  ;;  %2652 = vset.pattern.permute.xlu2 %v3184_v13  ;;  %v2450_v13 = vld [vmem:[%s3114_s19 + $0x90] sm:$0xff]  }
 0x1b9   : > { %v1468_v44 = vmul.f32 %v2235_v42, %v839_v54  ;;  %v2178_v42 = vld [vmem:[%s3114_s19] sm:$0xff]   ;;  %v864_v54 = vpop.permute.xlu2 %863 }
 0x1ba   : > { %v2180_v34 = vunpack.c.h.bf16 %v2178_v42 }
 0x1bb   : > { %v1600_v49 = vadd.f32 %v1599_v63, %v1468_v44  ;;  %v2179_v63 = vunpack.c.l.bf16 %v2178_v42  ;;  %v2434_v44 = vld [vmem:[%s3114_s19 + $0x10] sm:$0xff]  }
 0x1bc   : > { %v2188_v42 = vunpack.c.h.bf16 %v2434_v44 }
 0x1bd   : > { %v1601_v62 = vadd.f32 %v1600_v49, %v1469_v47  ;;  %v1440_v59 = vmul.f32 %v2179_v63, %v3271_v27  ;;  %v2449_v27 = vld [vmem:[%s3114_s19 + $0x88] sm:$0xff]   ;;  %v1443_v63 = vmul.f32 %v2184_v48, %v3275_v28 }
 0x1be   : > { %v1445_v52 = vmul.f32 %v2188_v42, %v3268_v26  ;;  %v2251_v26 = vunpack.c.l.bf16 %v2450_v13  ;;  %v2437_v42 = vld [vmem:[%s3114_s19 + $0x28] sm:$0xff]  }
 0x1bf   : > { %v1602_v0 = vadd.f32 %v1601_v62, %v1470_v61  ;;  %v1442_v61 = vmul.f32 %v2183_v37, %v3266_v25  ;;  %v2187_v62 = vunpack.c.l.bf16 %v2434_v44  ;;  %v2195_v37 = vunpack.c.l.bf16 %v2436_v53 }
 0x1c0   : > { %1008 = vperm.xlu1 %2651, %v3154_v7   ;;  %1014 = vperm.xlu2 %2652, %v3154_v7   ;;  %v3406_v57 = vpop.permute.xlu0 %1323  ;;  %v2248_v44 = vunpack.c.h.bf16 %v2449_v27 }
 0x1c1   : > { %v3404_v1 = vadd.f32 %v1602_v0, %v1471_v6  ;;  %3703 = vst [vmem:[#allocation36_spill] sm:$0xff] %v3406_v57  ;;  %v882_v46 = vpop.permute.xlu2 %881  ;;  %v2435_v6 = vld [vmem:[%s3114_s19 + $0x18] sm:$0xff]   ;;  %v2243_v57 = vunpack.c.l.bf16 %v2448_v43  ;;  %v1444_v60 = vmul.f32 %v2187_v62, %v3261_v24 }
 0x1c2   : > { %v2191_v56 = vunpack.c.l.bf16 %v2435_v6  ;;  %v2192_v25 = vunpack.c.h.bf16 %v2435_v6  ;;  %v1475_v4 = vmul.f32 %v2248_v44, %v882_v46 }
 0x1c3   : > { %v1472_v28 = vmul.f32 %v2243_v57, %v864_v54 }
 0x1c4   : > { %v1446_v24 = vmul.f32 %v2191_v56, %v3284_v31  ;;  %v1447_v6 = vmul.f32 %v2192_v25, %v3277_v29  ;;  %v2200_v56 = vunpack.c.h.bf16 %v2437_v42 }
 0x1c8   : > { %2654 = vset.pattern.permute.xlu1 %v3196_v15  ;;  %2655 = vset.pattern.permute.xlu2 %v3199_v16 }
 0x1c9   : > { %1762 = vadd.xlane.f32.xlu0 %v3143_v5  ;;  %v876_v5 = vpop.permute.xlu1 %875  ;;  %v894_v51 = vpop.permute.xlu2 %893 }
 0x1d0   : > { %1026 = vperm.xlu1 %2654, %v3154_v7   ;;  %v676_v47 = vpop.permute.xlu0 %675  ;;  %1032 = vperm.xlu2 %2655, %v3154_v7  }
 0x1d1   : > { %v1441_v49 = vmul.f32 %v2180_v34, %v676_v47  ;;  %v2247_v34 = vunpack.c.l.bf16 %v2449_v27  ;;  %v2199_v27 = vunpack.c.l.bf16 %v2437_v42 }
 0x1d3   : > { %v1568_v0 = vadd.f32 %v1441_v49, %v1440_v59  ;;  %v1474_v43 = vmul.f32 %v2247_v34, %v876_v5  ;;  %v912_v5 = vpop.permute.xlu2 %911  ;;  %v1450_v34 = vmul.f32 %v2199_v27, %v3286_v32 }
 0x1d5   : > { %v1569_v20 = vadd.f32 %v1568_v0, %v1442_v61  ;;  %v2196_v0 = vunpack.c.h.bf16 %v2436_v53 }
 0x1d7   : > { %v1570_v47 = vadd.f32 %v1569_v20, %v1443_v63  ;;  %v888_v20 = vpop.permute.xlu1 %887  ;;  %v1448_v63 = vmul.f32 %v2195_v37, %v3348_v55  ;;  %v1449_v29 = vmul.f32 %v2196_v0, %v3291_v33  ;;  %v2452_v0 = vld [vmem:[%s3114_s19 + $0xa0] sm:$0xff]  }
 0x1d8   : > { %2656 = vset.pattern.permute.xlu1 %v3256_v23  ;;  %v870_v59 = vpop.permute.xlu0 %869  ;;  %2657 = vset.pattern.permute.xlu2 %v3211_v18  ;;  %v2252_v18 = vunpack.c.h.bf16 %v2450_v13 }
 0x1d9   : > { %v1571_v48 = vadd.f32 %v1570_v47, %v1444_v60  ;;  %v1473_v49 = vmul.f32 %v2244_v50, %v870_v59  ;;  %v2438_v50 = vld [vmem:[%s3114_s19 + $0x30] sm:$0xff]   ;;  %v1476_v60 = vmul.f32 %v2251_v26, %v888_v20 }
 0x1da   : > { %v2203_v13 = vunpack.c.l.bf16 %v2438_v50  ;;  %v2204_v25 = vunpack.c.h.bf16 %v2438_v50 }
 0x1db   : > { %v1572_v61 = vadd.f32 %v1571_v48, %v1445_v52  ;;  %v1610_v62 = vadd.f32 %v1473_v49, %v1472_v28  ;;  %v1477_v52 = vmul.f32 %v2252_v18, %v894_v51  ;;  %v2439_v28 = vld [vmem:[%s3114_s19 + $0x38] sm:$0xff]   ;;  %v1604_v51 = vrot.slane %v3404_v1, 4  ;;  %v924_v32 = vpop.permute.xlu2 %923 }
 0x1dc   : > { %v1452_v48 = vmul.f32 %v2203_v13, %v3298_v36  ;;  %v2207_v33 = vunpack.c.l.bf16 %v2439_v28  ;;  %v1453_v18 = vmul.f32 %v2204_v25, %v3362_v58 }
 0x1dd   : > { %v1573_v57 = vadd.f32 %v1572_v61, %v1446_v24  ;;  %v1611_v54 = vadd.f32 %v1610_v62, %v1474_v43  ;;  %v2208_v24 = vunpack.c.h.bf16 %v2439_v28  ;;  %v1605_v36 = vadd.f32 %v1604_v51, %v3404_v1  ;;  %v2451_v61 = vld [vmem:[%s3114_s19 + $0x98] sm:$0xff]  }
 0x1de   : > { %v1454_v43 = vmul.f32 %v2207_v33, %v3315_v41  ;;  %v2259_v41 = vunpack.c.l.bf16 %v2452_v0 }
 0x1df   : > { %v1574_v47 = vadd.f32 %v1573_v57, %v1447_v6  ;;  %v1612_v31 = vadd.f32 %v1611_v54, %v1475_v4  ;;  %v906_v46 = vpop.permute.xlu1 %905  ;;  %v1451_v4 = vmul.f32 %v2200_v56, %v3306_v38  ;;  %v1455_v58 = vmul.f32 %v2208_v24, %v3310_v40  ;;  %v2457_v24 = vld [vmem:[%s3114_s19 + $0xc8] sm:$0xff]  }
 0x1e0   : > { %1038 = vperm.xlu1 %2656, %v3154_v7   ;;  %1044 = vperm.xlu2 %2657, %v3154_v7   ;;  %v3440_v7 = vpop.permute.xlu0 %1354  ;;  %v2255_v6 = vunpack.c.l.bf16 %v2451_v61  ;;  %v1606_v42 = vrot.slane %v1605_v36, 2 }
 0x1e1   : > { %v1575_v53 = vadd.f32 %v1574_v47, %v1448_v63  ;;  %v1613_v55 = vadd.f32 %v1612_v31, %v1476_v60  ;;  %v2256_v63 = vunpack.c.h.bf16 %v2451_v61  ;;  %v2260_v60 = vunpack.c.h.bf16 %v2452_v0  ;;  %v2453_v47 = vld [vmem:[%s3114_s19 + $0xa8] sm:$0xff]   ;;  %v2454_v0 = vld [vmem:[%s3114_s19 + $0xb0] sm:$0xff]  }
 0x1e2   : > { %v1607_v56 = vadd.f32 %v1606_v42, %v1605_v36 }
 0x1e3   : > { %v1576_v37 = vadd.f32 %v1575_v53, %v1449_v29  ;;  %v1614_v59 = vadd.f32 %v1613_v55, %v1477_v52  ;;  %v942_v54 = vpop.permute.xlu2 %941  ;;  %v1479_v40 = vmul.f32 %v2256_v63, %v906_v46  ;;  %v1480_v53 = vmul.f32 %v2259_v41, %v912_v5  ;;  %v2455_v41 = vld [vmem:[%s3114_s19 + $0xb8] sm:$0xff]  }
 0x1e4   : > { %v2263_v55 = vunpack.c.l.bf16 %v2453_v47  ;;  %v1608_v25 = vrot.slane %v1607_v56, 1  ;;  %v2264_v63 = vunpack.c.h.bf16 %v2453_v47  ;;  %v2280_v47 = vunpack.c.h.bf16 %v2457_v24 }
 0x1e5   : > { %v1577_v44 = vadd.f32 %v1576_v37, %v1450_v34 }
 0x1e6   : > { %v1609_v5 = vadd.f32 %v1608_v25, %v1607_v56 }
 0x1e7   : > { %v1578_v49 = vadd.f32 %v1577_v44, %v1451_v4  ;;  %v918_v20 = vpop.permute.xlu1 %917 }
 0x1e8   : > { %2659 = vset.pattern.permute.xlu1 %v3134_v2  ;;  %2660 = vset.pattern.permute.xlu2 %v3220_v19  ;;  %v1481_v37 = vmul.f32 %v2260_v60, %v918_v20 }
 0x1e9   : > { %v1579_v38 = vadd.f32 %v1578_v49, %v1452_v48  ;;  %v1482_v48 = vmul.f32 %v2263_v55, %v924_v32 }
 0x1eb   : > { %v1580_v26 = vadd.f32 %v1579_v38, %v1453_v18  ;;  %v954_v44 = vpop.permute.xlu2 %953 }
 0x1ed   : > { %v1581_v62 = vadd.f32 %v1580_v26, %v1454_v43  ;;  %v2279_v26 = vunpack.c.l.bf16 %v2457_v24 }
 0x1ef   : > { %v1582_v57 = vadd.f32 %v1581_v62, %v1455_v58  ;;  %v936_v31 = vpop.permute.xlu1 %935 }
 0x1f0   : > { %1057 = vperm.xlu1 %2659, %v3208_v17   ;;  %v900_v27 = vpop.permute.xlu0 %899  ;;  %1063 = vperm.xlu2 %2660, %v3208_v17  }
 0x1f1   : > { %v1478_v50 = vmul.f32 %v2255_v6, %v900_v27  ;;  %v1583_v1 = vrot.slane %v1582_v57, 4 }
 0x1f3   : > { %v1615_v29 = vadd.f32 %v1614_v59, %v1478_v50  ;;  %v1584_v52 = vadd.f32 %v1583_v1, %v1582_v57  ;;  %v2456_v59 = vld [vmem:[%s3114_s19 + $0xc0] sm:$0xff]   ;;  %v973_v32 = vpop.permute.xlu2 %972  ;;  %v2267_v57 = vunpack.c.l.bf16 %v2454_v0  ;;  %v2268_v1 = vunpack.c.h.bf16 %v2454_v0 }
 0x1f4   : > { %v2275_v38 = vunpack.c.l.bf16 %v2456_v59  ;;  %v2276_v36 = vunpack.c.h.bf16 %v2456_v59  ;;  %v1490_v6 = vmul.f32 %v2279_v26, %v973_v32 }
 0x1f5   : > { %v1616_v13 = vadd.f32 %v1615_v29, %v1479_v40  ;;  %v1585_v34 = vrot.slane %v1584_v52, 2  ;;  %v1484_v56 = vmul.f32 %v2267_v57, %v936_v31  ;;  %v2271_v40 = vunpack.c.l.bf16 %v2455_v41  ;;  %v2458_v29 = vld [vmem:[%s3114_s19 + $0xd0] sm:$0xff]  }
 0x1f6   : > { %v1488_v61 = vmul.f32 %v2275_v38, %v3282_v30  ;;  %v2283_v25 = vunpack.c.l.bf16 %v2458_v29 }
 0x1f7   : > { %v1617_v28 = vadd.f32 %v1616_v13, %v1480_v53  ;;  %v1586_v4 = vadd.f32 %v1585_v34, %v1584_v52  ;;  %v948_v18 = vpop.permute.xlu1 %947  ;;  %v1485_v52 = vmul.f32 %v2268_v1, %v942_v54  ;;  %v2272_v53 = vunpack.c.h.bf16 %v2455_v41  ;;  %v2461_v41 = vld [vmem:[%s3114_s19 + $0xe8] sm:$0xff]  }
 0x1f8   : > { %2661 = vset.pattern.permute.xlu1 %v3138_v3  ;;  %2662 = vset.pattern.permute.xlu2 %v3157_v8  ;;  %v3460_v43 = vpop.permute.xlu0 %1384  ;;  %v1486_v13 = vmul.f32 %v2271_v40, %v948_v18 }
 0x1f9   : > { %v1618_v33 = vadd.f32 %v1617_v28, %v1481_v37  ;;  %v1587_v46 = vrot.slane %v1586_v4, 1  ;;  %v2284_v28 = vunpack.c.h.bf16 %v2458_v29 }
 0x1fb   : > { %v1619_v51 = vadd.f32 %v1618_v33, %v1482_v48  ;;  %v1588_v49 = vadd.f32 %v1587_v46, %v1586_v4  ;;  %v985_v37 = vpop.permute.xlu2 %984  ;;  %v1487_v4 = vmul.f32 %v2272_v53, %v954_v44  ;;  %v1493_v54 = vmul.f32 %v2284_v28, %v3296_v35  ;;  %v2459_v44 = vld [vmem:[%s3114_s19 + $0xd8] sm:$0xff]  }
 0x1fc   : > { %v1492_v59 = vmul.f32 %v2283_v25, %v985_v37 }
 0x1fd   : > { %v3458_v20 = vsel %vm1744_vm1, %v1609_v5, %v1588_v49 }
 0x200   : > { %1069 = vperm.xlu1 %2661, %v3208_v17   ;;  %1075 = vperm.xlu2 %2662, %v3208_v17  }
 0x202   : > { %v967_v58 = vpop.permute.xlu1 %966 }
 0x203   : > { %v1489_v62 = vmul.f32 %v2276_v36, %v967_v58  ;;  %v2288_v58 = vunpack.c.h.bf16 %v2459_v44 }
 0x205   : > { %v1631_v42 = vadd.f32 %v1489_v62, %v1488_v61  ;;  %v2287_v61 = vunpack.c.l.bf16 %v2459_v44  ;;  %v2464_v44 = vld [vmem:[%s3114_s19 + $0x100] sm:$0xff]  }
 0x207   : > { %v1632_v27 = vadd.f32 %v1631_v42, %v1490_v6 }
 0x208   : > { %2664 = vset.pattern.permute.xlu1 %v3161_v9  ;;  %v930_v50 = vpop.permute.xlu0 %929  ;;  %2665 = vset.pattern.permute.xlu2 %v3169_v10 }
 0x209   : > { %v1483_v60 = vmul.f32 %v2264_v63, %v930_v50 }
 0x20a   : > { %v1003_v35 = vpop.permute.xlu2 %1002 }
 0x20b   : > { %v1620_v30 = vadd.f32 %v1619_v51, %v1483_v60  ;;  %v1495_v42 = vmul.f32 %v2288_v58, %v1003_v35  ;;  %v2307_v35 = vunpack.c.l.bf16 %v2464_v44 }
 0x20d   : > { %v1621_v55 = vadd.f32 %v1620_v30, %v1484_v56 }
 0x20f   : > { %v1622_v34 = vadd.f32 %v1621_v55, %v1485_v52 }
 0x210   : > { %1087 = vperm.xlu1 %2664, %v3208_v17   ;;  %1093 = vperm.xlu2 %2665, %v3208_v17  }
 0x211   : > { %v1623_v48 = vadd.f32 %v1622_v34, %v1486_v13  ;;  %v2462_v13 = vld [vmem:[%s3114_s19 + $0xf0] sm:$0xff]   ;;  %v2296_v34 = vunpack.c.h.bf16 %v2461_v41 }
 0x212   : > { %v979_v31 = vpop.permute.xlu1 %978 }
 0x213   : > { %v1624_v33 = vadd.f32 %v1623_v48, %v1487_v4  ;;  %v1491_v46 = vmul.f32 %v2280_v47, %v979_v31  ;;  %v2299_v47 = vunpack.c.l.bf16 %v2462_v13  ;;  %v2463_v31 = vld [vmem:[%s3114_s19 + $0xf8] sm:$0xff]  }
 0x215   : > { %v1625_v5 = vrot.slane %v1624_v33, 4  ;;  %v1633_v18 = vadd.f32 %v1632_v27, %v1491_v46  ;;  %v2460_v27 = vld [vmem:[%s3114_s19 + $0xe0] sm:$0xff]   ;;  %v2303_v46 = vunpack.c.l.bf16 %v2463_v31 }
 0x216   : > { %v2291_v50 = vunpack.c.l.bf16 %v2460_v27  ;;  %v2292_v1 = vunpack.c.h.bf16 %v2460_v27 }
 0x217   : > { %v1626_v51 = vadd.f32 %v1625_v5, %v1624_v33  ;;  %v1634_v49 = vadd.f32 %v1633_v18, %v1492_v59  ;;  %v2300_v33 = vunpack.c.h.bf16 %v2462_v13 }
 0x218   : > { %2666 = vset.pattern.permute.xlu1 %v3172_v11  ;;  %2667 = vset.pattern.permute.xlu2 %v3244_v22 }
 0x219   : > { %v1627_v24 = vrot.slane %v1626_v51, 2  ;;  %v1635_v38 = vadd.f32 %v1634_v49, %v1493_v54  ;;  %v2304_v54 = vunpack.c.h.bf16 %v2463_v31 }
 0x21a   : > { %v1015_v60 = vpop.permute.xlu2 %1014 }
 0x21b   : > { %v1628_v36 = vadd.f32 %v1627_v24, %v1626_v51  ;;  %v1497_v30 = vmul.f32 %v2292_v1, %v1015_v60  ;;  %v1503_v49 = vmul.f32 %v2304_v54, %v3319_v45  ;;  %v2465_v1 = vld [vmem:[%s3114_s19 + $0x108] sm:$0xff]   ;;  %v2466_v60 = vld [vmem:[%s3114_s19 + $0x110] sm:$0xff]   ;;  %v2468_v54 = vld [vmem:[%s3114_s19 + $0x120] sm:$0xff]  }
 0x21d   : > { %v1629_v26 = vrot.slane %v1628_v36, 1 }
 0x21f   : > { %v1630_v32 = vadd.f32 %v1629_v26, %v1628_v36 }
 0x220   : > { %1099 = vperm.xlu1 %2666, %v3208_v17   ;;  %1105 = vperm.xlu2 %2667, %v3208_v17  }
 0x221   : > { %v3479_v62 = vsel %vm1746_vm2, %v1630_v32, %v3458_v20  ;;  %v2295_v20 = vunpack.c.l.bf16 %v2461_v41 }
 0x222   : > { %v997_v6 = vpop.permute.xlu1 %996 }
 0x223   : > { %v1494_v0 = vmul.f32 %v2287_v61, %v997_v6  ;;  %v1498_v29 = vmul.f32 %v2295_v20, %v3308_v39  ;;  %v2311_v20 = vunpack.c.l.bf16 %v2465_v1 }
 0x225   : > { %v1636_v63 = vadd.f32 %v1635_v38, %v1494_v0 }
 0x227   : > { %v1637_v57 = vadd.f32 %v1636_v63, %v1495_v42 }
 0x228   : > { %2669 = vset.pattern.permute.xlu1 %v3178_v12  ;;  %2670 = vset.pattern.permute.xlu2 %v3196_v15 }
 0x22a   : > { %v1033_v25 = vpop.permute.xlu2 %1032 }
 0x22b   : > { %v1500_v4 = vmul.f32 %v2299_v47, %v1033_v25  ;;  %v2467_v25 = vld [vmem:[%s3114_s19 + $0x118] sm:$0xff]  }
 0x230   : > { %1117 = vperm.xlu1 %2669, %v3208_v17   ;;  %1123 = vperm.xlu2 %2670, %v3208_v17  }
 0x232   : > { %v1009_v56 = vpop.permute.xlu1 %1008 }
 0x233   : > { %v1496_v40 = vmul.f32 %v2291_v50, %v1009_v56  ;;  %v3704_v50 = vld [vmem:[#allocation23_spill] sm:$0xff]  ;;  %v2312_v56 = vunpack.c.h.bf16 %v2465_v1  ;;  %v3708_v1 = vld [vmem:[#allocation25_spill] sm:$0xff] }
 0x235   : > { %v1638_v52 = vadd.f32 %v1637_v57, %v1496_v40 }
 0x237   : > { %v1639_v53 = vadd.f32 %v1638_v52, %v1497_v30  ;;  %v2315_v30 = vunpack.c.l.bf16 %v2466_v60 }
 0x238   : > { %2671 = vset.pattern.permute.xlu1 %v3199_v16  ;;  %2672 = vset.pattern.permute.xlu2 %v3256_v23 }
 0x239   : > { %v1640_v55 = vadd.f32 %v1639_v53, %v1498_v29 }
 0x23a   : > { %v1045_v59 = vpop.permute.xlu2 %1044 }
 0x23b   : > { %v1502_v51 = vmul.f32 %v2303_v46, %v1045_v59  ;;  %v3706_v59 = vld [vmem:[#allocation24_spill] sm:$0xff] }
 0x240   : > { %1129 = vperm.xlu1 %2671, %v3208_v17   ;;  %1135 = vperm.xlu2 %2672, %v3208_v17  }
 0x242   : > { %v1027_v37 = vpop.permute.xlu1 %1026 }
 0x243   : > { %v1499_v28 = vmul.f32 %v2296_v34, %v1027_v37  ;;  %v2316_v37 = vunpack.c.h.bf16 %v2466_v60  ;;  %v2470_v60 = vld [vmem:[%s3114_s19 + $0x130] sm:$0xff]  }
 0x245   : > { %v1641_v39 = vadd.f32 %v1640_v55, %v1499_v28  ;;  %v2319_v28 = vunpack.c.l.bf16 %v2467_v25 }
 0x247   : > { %v1642_v48 = vadd.f32 %v1641_v39, %v1500_v4 }
 0x248   : > { %2674 = vset.pattern.permute.xlu1 %v3190_v14  ;;  %2675 = vset.pattern.permute.xlu2 %v3134_v2 }
 0x24a   : > { %v1064_v61 = vpop.permute.xlu2 %1063 }
 0x250   : > { %1147 = vperm.xlu1 %2674, %v3208_v17   ;;  %1154 = vperm.xlu2 %2675, %v3238_v21   ;;  %v2308_v17 = vunpack.c.h.bf16 %v2464_v44  ;;  %v3707_v44 = vld [vmem:[#allocation28_spill] sm:$0xff] }
 0x252   : > { %v1039_v5 = vpop.permute.xlu1 %1038  ;;  %v1505_v6 = vmul.f32 %v2308_v17, %v1064_v61 }
 0x253   : > { %v1501_v18 = vmul.f32 %v2300_v33, %v1039_v5  ;;  %v2320_v5 = vunpack.c.h.bf16 %v2467_v25 }
 0x255   : > { %v1643_v24 = vadd.f32 %v1642_v48, %v1501_v18  ;;  %v2323_v18 = vunpack.c.l.bf16 %v2468_v54 }
 0x257   : > { %v1644_v38 = vadd.f32 %v1643_v24, %v1502_v51 }
 0x258   : > { %2676 = vset.pattern.permute.xlu1 %v3220_v19  ;;  %2677 = vset.pattern.permute.xlu2 %v3138_v3 }
 0x259   : > { %v1645_v36 = vadd.f32 %v1644_v38, %v1503_v49  ;;  %v2324_v49 = vunpack.c.h.bf16 %v2468_v54  ;;  %v2473_v54 = vld [vmem:[%s3114_s19 + $0x148] sm:$0xff]  }
 0x25a   : > { %v1076_v40 = vpop.permute.xlu2 %1075 }
 0x25b   : > { %v1646_v26 = vrot.slane %v1645_v36, 4  ;;  %v1507_v53 = vmul.f32 %v2312_v56, %v1076_v40  ;;  %v2331_v56 = vunpack.c.l.bf16 %v2470_v60  ;;  %v2332_v40 = vunpack.c.h.bf16 %v2470_v60 }
 0x25d   : > { %v1647_v32 = vadd.f32 %v1646_v26, %v1645_v36  ;;  %v1513_v26 = vmul.f32 %v2324_v49, %v3707_v44 }
 0x25f   : > { %v1648_v58 = vrot.slane %v1647_v32, 2 }
 0x260   : > { %1160 = vperm.xlu1 %2676, %v3238_v21   ;;  %1166 = vperm.xlu2 %2677, %v3238_v21  }
 0x261   : > { %v1649_v45 = vadd.f32 %v1648_v58, %v1647_v32  ;;  %v2469_v58 = vld [vmem:[%s3114_s19 + $0x128] sm:$0xff]  }
 0x262   : > { %v1058_v0 = vpop.permute.xlu1 %1057 }
 0x263   : > { %v1650_v42 = vrot.slane %v1649_v45, 1  ;;  %v1504_v63 = vmul.f32 %v2307_v35, %v1058_v0  ;;  %v2327_v35 = vunpack.c.l.bf16 %v2469_v58 }
 0x265   : > { %v1651_v57 = vadd.f32 %v1650_v42, %v1649_v45  ;;  %v1652_v27 = vadd.f32 %v1505_v6, %v1504_v63  ;;  %v2328_v45 = vunpack.c.h.bf16 %v2469_v58 }
 0x267   : > { %v3505_v41 = vsel %vm1748_vm3, %v1651_v57, %v3479_v62  ;;  %v3705_v62 = vld [vmem:[#allocation27_spill] sm:$0xff] }
 0x268   : > { %2680 = vset.pattern.permute.xlu1 %v3704_v50  ;;  %2681 = vset.pattern.permute.xlu2 %v3161_v9  ;;  %v1508_v55 = vmul.f32 %v2315_v30, %v3705_v62 }
 0x26a   : > { %v1094_v4 = vpop.permute.xlu2 %1093 }
 0x26b   : > { %v1510_v31 = vmul.f32 %v2319_v28, %v1094_v4  ;;  %v3710_v28 = vld [vmem:[#allocation26_spill] sm:$0xff] }
 0x270   : > { %1178 = vperm.xlu1 %2680, %v3238_v21   ;;  %1184 = vperm.xlu2 %2681, %v3238_v21  }
 0x272   : > { %v1070_v29 = vpop.permute.xlu1 %1069 }
 0x273   : > { %v1506_v52 = vmul.f32 %v2311_v20, %v1070_v29  ;;  %v2471_v20 = vld [vmem:[%s3114_s19 + $0x138] sm:$0xff]  }
 0x274   : > { %v2335_v29 = vunpack.c.l.bf16 %v2471_v20 }
 0x275   : > { %v1653_v13 = vadd.f32 %v1652_v27, %v1506_v52 }
 0x277   : > { %v1654_v34 = vadd.f32 %v1653_v13, %v1507_v53 }
 0x278   : > { %2682 = vset.pattern.permute.xlu1 %v3169_v10  ;;  %2683 = vset.pattern.permute.xlu2 %v3172_v11 }
 0x279   : > { %v1655_v47 = vadd.f32 %v1654_v34, %v1508_v55  ;;  %v3709_v55 = vld [vmem:[#allocation29_spill] sm:$0xff] }
 0x27a   : > { %v1106_v51 = vpop.permute.xlu2 %1105  ;;  %v1518_v13 = vmul.f32 %v2335_v29, %v3709_v55  ;;  %v2476_v29 = vld [vmem:[%s3114_s19 + $0x160] sm:$0xff]  }
 0x27b   : > { %v1512_v36 = vmul.f32 %v2323_v18, %v1106_v51  ;;  %v2355_v55 = vunpack.c.l.bf16 %v2476_v29 }
 0x280   : > { %1190 = vperm.xlu1 %2682, %v3238_v21   ;;  %1196 = vperm.xlu2 %2683, %v3238_v21  }
 0x282   : > { %v1088_v39 = vpop.permute.xlu1 %1087 }
 0x283   : > { %v1509_v48 = vmul.f32 %v2316_v37, %v1088_v39  ;;  %v2336_v37 = vunpack.c.h.bf16 %v2471_v20 }
 0x285   : > { %v1656_v33 = vadd.f32 %v1655_v47, %v1509_v48 }
 0x287   : > { %v1657_v46 = vadd.f32 %v1656_v33, %v1510_v31 }
 0x288   : > { %2685 = vset.pattern.permute.xlu1 %v3706_v59  ;;  %2686 = vset.pattern.permute.xlu2 %v3178_v12 }
 0x28a   : > { %v1124_v6 = vpop.permute.xlu2 %1123 }
 0x28b   : > { %v1515_v63 = vmul.f32 %v2328_v45, %v1124_v6 }
 0x290   : > { %1208 = vperm.xlu1 %2685, %v3238_v21   ;;  %1214 = vperm.xlu2 %2686, %v3238_v21  }
 0x292   : > { %v1100_v24 = vpop.permute.xlu1 %1099 }
 0x293   : > { %v1511_v38 = vmul.f32 %v2320_v5, %v1100_v24  ;;  %v2472_v5 = vld [vmem:[%s3114_s19 + $0x140] sm:$0xff]   ;;  %v2343_v24 = vunpack.c.l.bf16 %v2473_v54 }
 0x294   : > { %v2339_v51 = vunpack.c.l.bf16 %v2472_v5  ;;  %v2340_v49 = vunpack.c.h.bf16 %v2472_v5 }
 0x295   : > { %v1658_v32 = vadd.f32 %v1657_v46, %v1511_v38 }
 0x297   : > { %v1659_v17 = vadd.f32 %v1658_v32, %v1512_v36  ;;  %v2344_v36 = vunpack.c.h.bf16 %v2473_v54 }
 0x298   : > { %2687 = vset.pattern.permute.xlu1 %v3196_v15  ;;  %2688 = vset.pattern.permute.xlu2 %v3199_v16 }
 0x299   : > { %v1660_v61 = vadd.f32 %v1659_v17, %v1513_v26 }
 0x29a   : > { %v1136_v30 = vpop.permute.xlu2 %1135 }
 0x29b   : > { %v1517_v62 = vmul.f32 %v2332_v40, %v1136_v30 }
 0x2a0   : > { %1220 = vperm.xlu1 %2687, %v3238_v21   ;;  %1226 = vperm.xlu2 %2688, %v3238_v21  }
 0x2a2   : > { %v1118_v0 = vpop.permute.xlu1 %1117 }
 0x2a3   : > { %v1514_v42 = vmul.f32 %v2327_v35, %v1118_v0  ;;  %v3711_v35 = vld [vmem:[#allocation30_spill] sm:$0xff] }
 0x2a4   : > { %v1523_v45 = vmul.f32 %v2344_v36, %v3711_v35 }
 0x2a5   : > { %v1661_v57 = vadd.f32 %v1660_v61, %v1514_v42 }
 0x2a7   : > { %v1662_v27 = vadd.f32 %v1661_v57, %v1515_v63  ;;  %v2474_v63 = vld [vmem:[%s3114_s19 + $0x150] sm:$0xff]  }
 0x2a8   : > { %2690 = vset.pattern.permute.xlu1 %v3708_v1  ;;  %2691 = vset.pattern.permute.xlu2 %v3190_v14  ;;  %v2347_v57 = vunpack.c.l.bf16 %v2474_v63 }
 0x2aa   : > { %v1155_v31 = vpop.permute.xlu2 %1154 }
 0x2ab   : > { %v1520_v17 = vmul.f32 %v2339_v51, %v1155_v31  ;;  %v2356_v31 = vunpack.c.h.bf16 %v2476_v29  ;;  %v2481_v29 = vld [vmem:[%s3114_s19 + $0x188] sm:$0xff]  }
 0x2b0   : > { %1238 = vperm.xlu1 %2690, %v3238_v21   ;;  %1244 = vperm.xlu2 %2691, %v3238_v21  }
 0x2b2   : > { %v1130_v52 = vpop.permute.xlu1 %1129 }
 0x2b3   : > { %v1516_v53 = vmul.f32 %v2331_v56, %v1130_v52 }
 0x2b5   : > { %v1663_v34 = vadd.f32 %v1662_v27, %v1516_v53  ;;  %v2348_v27 = vunpack.c.h.bf16 %v2474_v63 }
 0x2b7   : > { %v1664_v47 = vadd.f32 %v1663_v34, %v1517_v62 }
 0x2b8   : > { %2692 = vset.pattern.permute.xlu1 %v3134_v2  ;;  %2693 = vset.pattern.permute.xlu2 %v3220_v19 }
 0x2b9   : > { %v1665_v25 = vadd.f32 %v1664_v47, %v1518_v13 }
 0x2ba   : > { %v1167_v38 = vpop.permute.xlu2 %1166 }
 0x2bb   : > { %v1522_v58 = vmul.f32 %v2343_v24, %v1167_v38 }
 0x2c0   : > { %1251 = vperm.xlu1 %2692, %v3710_v28   ;;  %1257 = vperm.xlu2 %2693, %v3710_v28  }
 0x2c2   : > { %v1148_v21 = vpop.permute.xlu1 %1147 }
 0x2c3   : > { %v1519_v4 = vmul.f32 %v2336_v37, %v1148_v21 }
 0x2c5   : > { %v1666_v39 = vadd.f32 %v1665_v25, %v1519_v4  ;;  %v3712_v25 = vld [vmem:[#allocation32_spill] sm:$0xff] }
 0x2c6   : > { %v1528_v37 = vmul.f32 %v2355_v55, %v3712_v25 }
 0x2c7   : > { %v1667_v48 = vrot.slane %v1666_v39, 4 }
 0x2c8   : > { %2695 = vset.pattern.permute.xlu1 %v3157_v8  ;;  %2696 = vset.pattern.permute.xlu2 %v3704_v50 }
 0x2c9   : > { %v1668_v33 = vadd.f32 %v1667_v48, %v1666_v39  ;;  %v2477_v48 = vld [vmem:[%s3114_s19 + $0x168] sm:$0xff]  }
 0x2cb   : > { %v1669_v46 = vrot.slane %v1668_v33, 2 }
 0x2cd   : > { %v1670_v19 = vadd.f32 %v1669_v46, %v1668_v33  ;;  %v2359_v33 = vunpack.c.l.bf16 %v2477_v48 }
 0x2cf   : > { %v1671_v18 = vrot.slane %v1670_v19, 1 }
 0x2d0   : > { %1269 = vperm.xlu1 %2695, %v3710_v28   ;;  %1275 = vperm.xlu2 %2696, %v3710_v28  }
 0x2d1   : > { %v1672_v44 = vadd.f32 %v1671_v18, %v1670_v19 }
 0x2d2   : > { %v1161_v26 = vpop.permute.xlu1 %1160 }
 0x2d3   : > { %v3548_v32 = vsel %vm1750_vm4, %v1672_v44, %v3505_v41  ;;  %v1521_v61 = vmul.f32 %v2340_v49, %v1161_v26  ;;  %v1185_v41 = vpop.permute.xlu2 %1184  ;;  %v2478_v49 = vld [vmem:[%s3114_s19 + $0x170] sm:$0xff]  }
 0x2d4   : > { %v1525_v56 = vmul.f32 %v2348_v27, %v1185_v41  ;;  %v2363_v24 = vunpack.c.l.bf16 %v2478_v49  ;;  %v2364_v36 = vunpack.c.h.bf16 %v2478_v49  ;;  %v3714_v27 = vld [vmem:[#allocation31_spill] sm:$0xff] }
 0x2d5   : > { %v1673_v6 = vadd.f32 %v1521_v61, %v1520_v17  ;;  %v3713_v61 = vld [vmem:[#allocation33_spill] sm:$0xff] }
 0x2d7   : > { %v1674_v0 = vadd.f32 %v1673_v6, %v1522_v58  ;;  %v1533_v58 = vmul.f32 %v2364_v36, %v3713_v61 }
 0x2d8   : > { %2697 = vset.pattern.permute.xlu1 %v3161_v9  ;;  %2698 = vset.pattern.permute.xlu2 %v3169_v10  ;;  %v2475_v10 = vld [vmem:[%s3114_s19 + $0x158] sm:$0xff]  }
 0x2d9   : > { %v1675_v42 = vadd.f32 %v1674_v0, %v1523_v45  ;;  %v2351_v52 = vunpack.c.l.bf16 %v2475_v10  ;;  %v2352_v53 = vunpack.c.h.bf16 %v2475_v10  ;;  %v2479_v0 = vld [vmem:[%s3114_s19 + $0x178] sm:$0xff]  }
 0x2da   : > { %v2368_v63 = vunpack.c.h.bf16 %v2479_v0 }
 0x2db   : > { %v1197_v62 = vpop.permute.xlu2 %1196 }
 0x2dc   : > { %v1527_v47 = vmul.f32 %v2352_v53, %v1197_v62 }
 0x2e0   : > { %1281 = vperm.xlu1 %2697, %v3710_v28   ;;  %1287 = vperm.xlu2 %2698, %v3710_v28  }
 0x2e2   : > { %v1179_v60 = vpop.permute.xlu1 %1178 }
 0x2e3   : > { %v1524_v20 = vmul.f32 %v2347_v57, %v1179_v60 }
 0x2e5   : > { %v1676_v40 = vadd.f32 %v1675_v42, %v1524_v20  ;;  %v2367_v42 = vunpack.c.l.bf16 %v2479_v0 }
 0x2e7   : > { %v1677_v30 = vadd.f32 %v1676_v40, %v1525_v56 }
 0x2e8   : > { %2700 = vset.pattern.permute.xlu1 %v3244_v22  ;;  %2701 = vset.pattern.permute.xlu2 %v3706_v59 }
 0x2ea   : > { %v1215_v46 = vpop.permute.xlu2 %1214 }
 0x2eb   : > { %v1530_v19 = vmul.f32 %v2359_v33, %v1215_v46  ;;  %v2376_v33 = vunpack.c.h.bf16 %v2481_v29 }
 0x2f0   : > { %1299 = vperm.xlu1 %2700, %v3710_v28   ;;  %1305 = vperm.xlu2 %2701, %v3710_v28  }
 0x2f2   : > { %v1191_v13 = vpop.permute.xlu1 %1190 }
 0x2f3   : > { %v1526_v34 = vmul.f32 %v2351_v52, %v1191_v13 }
 0x2f5   : > { %v1678_v21 = vadd.f32 %v1677_v30, %v1526_v34  ;;  %v2480_v30 = vld [vmem:[%s3114_s19 + $0x180] sm:$0xff]  }
 0x2f6   : > { %v2372_v53 = vunpack.c.h.bf16 %v2480_v30  ;;  %v2371_v13 = vunpack.c.l.bf16 %v2480_v30 }
 0x2f7   : > { %v1679_v4 = vadd.f32 %v1678_v21, %v1527_v47 }
 0x2f8   : > { %2702 = vset.pattern.permute.xlu1 %v3178_v12  ;;  %2703 = vset.pattern.permute.xlu2 %v3196_v15  ;;  %v2360_v15 = vunpack.c.h.bf16 %v2477_v48 }
 0x2f9   : > { %v1680_v39 = vadd.f32 %v1679_v4, %v1528_v37 }
 0x2fa   : > { %v1227_v38 = vpop.permute.xlu2 %1226 }
 0x2fb   : > { %v1532_v17 = vmul.f32 %v2363_v24, %v1227_v38 }
 0x300   : > { %1311 = vperm.xlu1 %2702, %v3710_v28   ;;  %1317 = vperm.xlu2 %2703, %v3710_v28  }
 0x302   : > { %v1209_v54 = vpop.permute.xlu1 %1208 }
 0x303   : > { %v1529_v5 = vmul.f32 %v2356_v31, %v1209_v54  ;;  %v2482_v31 = vld [vmem:[%s3114_s19 + $0x190] sm:$0xff]  }
 0x304   : > { %v2379_v46 = vunpack.c.l.bf16 %v2482_v31  ;;  %v2380_v49 = vunpack.c.h.bf16 %v2482_v31 }
 0x305   : > { %v1681_v18 = vadd.f32 %v1680_v39, %v1529_v5 }
 0x307   : > { %v1682_v51 = vadd.f32 %v1681_v18, %v1530_v19 }
 0x308   : > { %2705 = vset.pattern.permute.xlu1 %v3256_v23  ;;  %2706 = vset.pattern.permute.xlu2 %v3708_v1 }
 0x30a   : > { %v1245_v57 = vpop.permute.xlu2 %1244 }
 0x30b   : > { %v1535_v20 = vmul.f32 %v2368_v63, %v1245_v57  ;;  %v2485_v63 = vld [vmem:[%s3114_s19 + $0x1a8] sm:$0xff]   ;;  %v2486_v57 = vld [vmem:[%s3114_s19 + $0x1b0] sm:$0xff]  }
 0x310   : > { %1329 = vperm.xlu1 %2705, %v3710_v28   ;;  %1335 = vperm.xlu2 %2706, %v3710_v28  }
 0x312   : > { %v1221_v44 = vpop.permute.xlu1 %1220 }
 0x313   : > { %v1531_v26 = vmul.f32 %v2360_v15, %v1221_v44 }
 0x315   : > { %v1683_v35 = vadd.f32 %v1682_v51, %v1531_v26  ;;  %v3716_v26 = vld [vmem:[#allocation35_spill] sm:$0xff] }
 0x317   : > { %v1684_v45 = vadd.f32 %v1683_v35, %v1532_v17 }
 0x318   : > { %2707 = vset.pattern.permute.xlu1 %v3190_v14  ;;  %2708 = vset.pattern.permute.xlu2 %v3134_v2 }
 0x319   : > { %v1685_v6 = vadd.f32 %v1684_v45, %v1533_v58  ;;  %v2484_v58 = vld [vmem:[%s3114_s19 + $0x1a0] sm:$0xff]  }
 0x31a   : > { %v1258_v62 = vpop.permute.xlu2 %1257  ;;  %v2387_v35 = vunpack.c.l.bf16 %v2484_v58 }
 0x31b   : > { %v1537_v47 = vmul.f32 %v2372_v53, %v1258_v62  ;;  %v2396_v62 = vunpack.c.h.bf16 %v2486_v57 }
 0x320   : > { %1341 = vperm.xlu1 %2707, %v3710_v28   ;;  %1348 = vperm.xlu2 %2708, %v3714_v27   ;;  %v2375_v28 = vunpack.c.l.bf16 %v2481_v29 }
 0x322   : > { %v1239_v41 = vpop.permute.xlu1 %1238 }
 0x323   : > { %v1534_v60 = vmul.f32 %v2367_v42, %v1239_v41  ;;  %v2388_v42 = vunpack.c.h.bf16 %v2484_v58 }
 0x325   : > { %v1686_v56 = vadd.f32 %v1685_v6, %v1534_v60  ;;  %v2392_v60 = vunpack.c.h.bf16 %v2485_v63 }
 0x327   : > { %v1687_v40 = vadd.f32 %v1686_v56, %v1535_v20  ;;  %v2395_v56 = vunpack.c.l.bf16 %v2486_v57 }
 0x328   : > { %2710 = vset.pattern.permute.xlu1 %v3138_v3  ;;  %2711 = vset.pattern.permute.xlu2 %v3157_v8  ;;  %v3715_v8 = vld [vmem:[#allocation34_spill] sm:$0xff] }
 0x329   : > { %v1688_v2 = vrot.slane %v1687_v40, 4  ;;  %v1538_v25 = vmul.f32 %v2375_v28, %v3715_v8 }
 0x32a   : > { %v1276_v54 = vpop.permute.xlu2 %1275 }
 0x32b   : > { %v1689_v10 = vadd.f32 %v1688_v2, %v1687_v40  ;;  %v1540_v18 = vmul.f32 %v2379_v46, %v1276_v54 }
 0x32d   : > { %v1690_v52 = vrot.slane %v1689_v10, 2 }
 0x32f   : > { %v1691_v55 = vadd.f32 %v1690_v52, %v1689_v10 }
 0x330   : > { %1360 = vperm.xlu1 %2710, %v3714_v27   ;;  %1366 = vperm.xlu2 %2711, %v3714_v27  }
 0x331   : > { %v1692_v34 = vrot.slane %v1691_v55, 1 }
 0x332   : > { %v1252_v3 = vpop.permute.xlu1 %1251 }
 0x333   : > { %v1693_v37 = vadd.f32 %v1692_v34, %v1691_v55  ;;  %v1536_v21 = vmul.f32 %v2371_v13, %v1252_v3  ;;  %v2487_v55 = vld [vmem:[%s3114_s19 + $0x1b8] sm:$0xff]  }
 0x334   : > { %v2399_v34 = vunpack.c.l.bf16 %v2487_v55 }
 0x335   : > { %v3587_v4 = vsel %vm1752_vm5, %v1693_v37, %v3548_v32  ;;  %v1694_v39 = vadd.f32 %v1537_v47, %v1536_v21 }
 0x337   : > { %v1695_v48 = vadd.f32 %v1694_v39, %v1538_v25  ;;  %v2400_v25 = vunpack.c.h.bf16 %v2487_v55  ;;  %v2494_v55 = vld [vmem:[%s3114_s19 + $0x1f0] sm:$0xff]  }
 0x338   : > { %2712 = vset.pattern.permute.xlu1 %v3704_v50  ;;  %2713 = vset.pattern.permute.xlu2 %v3161_v9  ;;  %v2483_v50 = vld [vmem:[%s3114_s19 + $0x198] sm:$0xff]  }
 0x339   : > { %v2383_v9 = vunpack.c.l.bf16 %v2483_v50  ;;  %v2384_v24 = vunpack.c.h.bf16 %v2483_v50 }
 0x33a   : > { %v1288_v15 = vpop.permute.xlu2 %1287 }
 0x33b   : > { %v1542_v44 = vmul.f32 %v2383_v9, %v1288_v15  ;;  %v1543_v17 = vmul.f32 %v2384_v24, %v3716_v26 }
 0x340   : > { %1372 = vperm.xlu1 %2712, %v3714_v27   ;;  %1378 = vperm.xlu2 %2713, %v3714_v27  }
 0x342   : > { %v1270_v5 = vpop.permute.xlu1 %1269 }
 0x343   : > { %v1539_v19 = vmul.f32 %v2376_v33, %v1270_v5 }
 0x345   : > { %v1696_v32 = vadd.f32 %v1695_v48, %v1539_v19  ;;  %v2488_v19 = vld [vmem:[%s3114_s19 + $0x1c0] sm:$0xff]  }
 0x347   : > { %v1697_v51 = vadd.f32 %v1696_v32, %v1540_v18  ;;  %v2489_v18 = vld [vmem:[%s3114_s19 + $0x1c8] sm:$0xff]   ;;  %v2404_v32 = vunpack.c.h.bf16 %v2488_v19 }
 0x348   : > { %2715 = vset.pattern.permute.xlu1 %v3172_v11  ;;  %2716 = vset.pattern.permute.xlu2 %v3244_v22 }
 0x349   : > { %v1553_v15 = vmul.f32 %v2404_v32, %v3440_v7 }
 0x34a   : > { %v1306_v6 = vpop.permute.xlu2 %1305 }
 0x34b   : > { %v1545_v41 = vmul.f32 %v2388_v42, %v1306_v6 }
 0x350   : > { %1390 = vperm.xlu1 %2715, %v3714_v27   ;;  %1396 = vperm.xlu2 %2716, %v3714_v27  }
 0x352   : > { %v1282_v38 = vpop.permute.xlu1 %1281 }
 0x353   : > { %v1541_v36 = vmul.f32 %v2380_v49, %v1282_v38  ;;  %v2407_v49 = vunpack.c.l.bf16 %v2489_v18  ;;  %v2490_v38 = vld [vmem:[%s3114_s19 + $0x1d0] sm:$0xff]  }
 0x355   : > { %v1698_v61 = vadd.f32 %v1697_v51, %v1541_v36  ;;  %v2403_v51 = vunpack.c.l.bf16 %v2488_v19 }
 0x357   : > { %v1699_v11 = vadd.f32 %v1698_v61, %v1542_v44  ;;  %v2408_v44 = vunpack.c.h.bf16 %v2489_v18 }
 0x358   : > { %2717 = vset.pattern.permute.xlu1 %v3706_v59  ;;  %2718 = vset.pattern.permute.xlu2 %v3178_v12  ;;  %v2391_v12 = vunpack.c.l.bf16 %v2485_v63 }
 0x359   : > { %v1700_v22 = vadd.f32 %v1699_v11, %v1543_v17  ;;  %v2411_v17 = vunpack.c.l.bf16 %v2490_v38 }
 0x35a   : > { %v1318_v20 = vpop.permute.xlu2 %1317 }
 0x35b   : > { %v1547_v30 = vmul.f32 %v2392_v60, %v1318_v20 }
 0x360   : > { %1402 = vperm.xlu1 %2717, %v3714_v27   ;;  %1408 = vperm.xlu2 %2718, %v3714_v27  }
 0x362   : > { %v1300_v45 = vpop.permute.xlu1 %1299 }
 0x363   : > { %v1544_v0 = vmul.f32 %v2387_v35, %v1300_v45  ;;  %v2412_v35 = vunpack.c.h.bf16 %v2490_v38  ;;  %v2491_v45 = vld [vmem:[%s3114_s19 + $0x1d8] sm:$0xff]  }
 0x364   : > { %v2416_v57 = vunpack.c.h.bf16 %v2491_v45 }
 0x365   : > { %v1701_v59 = vadd.f32 %v1700_v22, %v1544_v0  ;;  %v2415_v0 = vunpack.c.l.bf16 %v2491_v45 }
 0x367   : > { %v1702_v2 = vadd.f32 %v1701_v59, %v1545_v41  ;;  %v2492_v41 = vld [vmem:[%s3114_s19 + $0x1e0] sm:$0xff]  }
 0x368   : > { %2719 = vset.pattern.permute.xlu1 %v3199_v16  ;;  %2720 = vset.pattern.permute.xlu2 %v3256_v23  ;;  %v3717_v23 = vld [vmem:[#allocation36_spill] sm:$0xff] }
 0x369   : > { %v1548_v10 = vmul.f32 %v2395_v56, %v3717_v23  ;;  %v2419_v56 = vunpack.c.l.bf16 %v2492_v41 }
 0x36a   : > { %v1336_v47 = vpop.permute.xlu2 %1335 }
 0x36b   : > { %v1550_v8 = vmul.f32 %v2399_v34, %v1336_v47  ;;  %v1761_v47 = vld [vmem:[#allocation3] sm:$0xff] }
 0x370   : > { %1420 = vperm.xlu1 %2719, %v3714_v27   ;;  %1426 = vperm.xlu2 %2720, %v3714_v27  }
 0x372   : > { %v1312_v40 = vpop.permute.xlu1 %1311 }
 0x373   : > { %v1546_v16 = vmul.f32 %v2391_v12, %v1312_v40  ;;  %v1558_v12 = vmul.f32 %v2415_v0, %v3460_v43 }
 0x375   : > { %v1703_v29 = vadd.f32 %v1702_v2, %v1546_v16  ;;  %v2420_v2 = vunpack.c.h.bf16 %v2492_v41  ;;  %v1415_v16 = vpop.permute.xlu0 %1414 }
 0x377   : > { %v1704_v52 = vadd.f32 %v1703_v29, %v1547_v30  ;;  %v2493_v29 = vld [vmem:[%s3114_s19 + $0x1e8] sm:$0xff]  }
 0x378   : > { %2721 = vset.pattern.permute.xlu1 %v3708_v1  ;;  %2722 = vset.pattern.permute.xlu2 %v3190_v14 }
 0x379   : > { %v1705_v53 = vadd.f32 %v1704_v52, %v1548_v10 }
 0x37a   : > { %v1349_v5 = vpop.permute.xlu2 %1348 }
 0x37b   : > { %v1552_v24 = vmul.f32 %v2403_v51, %v1349_v5 }
 0x37d   : > { %v1715_v26 = vadd.f32 %v1553_v15, %v1552_v24  ;;  %v1763_v43 = vpop.xlane.xlu0 %1762 }
 0x380   : > { %1432 = vperm.xlu1 %2721, %v3714_v27   ;;  %1438 = vperm.xlu2 %2722, %v3714_v27  }
 0x382   : > { %v1330_v28 = vpop.permute.xlu1 %1329 }
 0x383   : > { %v1549_v13 = vmul.f32 %v2396_v62, %v1330_v28  ;;  %v2423_v62 = vunpack.c.l.bf16 %v2493_v29 }
 0x385   : > { %v1706_v3 = vadd.f32 %v1705_v53, %v1549_v13 }
 0x387   : > { %v1707_v1 = vadd.f32 %v1706_v3, %v1550_v8  ;;  %v1764_v3 = vadd.f32 %v1763_v43, %v1761_v47  ;;  %v2424_v8 = vunpack.c.h.bf16 %v2493_v29 }
 0x389   : > { %1766 = vst.msk [vmem:[#allocation3] sm:$0xff] %vm1765_vm7, %v1764_v3 }
 0x38a   : > { %v1367_v9 = vpop.permute.xlu2 %1366 }
 0x38b   : > { %v1555_v11 = vmul.f32 %v2408_v44, %v1367_v9 }
 0x392   : > { %v1342_v37 = vpop.permute.xlu1 %1341 }
 0x393   : > { %v1551_v21 = vmul.f32 %v2400_v25, %v1342_v37  ;;  %v2427_v25 = vunpack.c.l.bf16 %v2494_v55 }
 0x395   : > { %v1708_v14 = vadd.f32 %v1707_v1, %v1551_v21 }
 0x397   : > { %v1709_v39 = vrot.slane %v1708_v14, 4 }
 0x399   : > { %v1710_v48 = vadd.f32 %v1709_v39, %v1708_v14  ;;  %v1563_v14 = vmul.f32 %v2424_v8, %v1415_v16 }
 0x39a   : > { %v1379_v22 = vpop.permute.xlu2 %1378 }
 0x39b   : > { %v1711_v31 = vrot.slane %v1710_v48, 2  ;;  %v1557_v63 = vmul.f32 %v2412_v35, %v1379_v22 }
 0x39d   : > { %v1712_v27 = vadd.f32 %v1711_v31, %v1710_v48  ;;  %v2428_v48 = vunpack.c.h.bf16 %v2494_v55  ;;  %v2495_v31 = vld [vmem:[%s3114_s19 + $0x1f8] sm:$0xff]  }
 0x39e   : > { %v2431_v5 = vunpack.c.l.bf16 %v2495_v31  ;;  %v2432_v19 = vunpack.c.h.bf16 %v2495_v31 }
 0x39f   : > { %v1713_v33 = vrot.slane %v1712_v27, 1 }
 0x3a1   : > { %v1714_v46 = vadd.f32 %v1713_v33, %v1712_v27 }
 0x3a2   : > { %v1361_v50 = vpop.permute.xlu1 %1360 }
 0x3a3   : > { %v3618_v54 = vsel %vm1754_vm6, %v1714_v46, %v3587_v4  ;;  %v1554_v36 = vmul.f32 %v2407_v49, %v1361_v50 }
 0x3a5   : > { %v1716_v61 = vadd.f32 %v1715_v26, %v1554_v36 }
 0x3a7   : > { %v1717_v6 = vadd.f32 %v1716_v61, %v1555_v11 }
 0x3aa   : > { %v1397_v59 = vpop.permute.xlu2 %1396 }
 0x3ab   : > { %v1560_v10 = vmul.f32 %v2419_v56, %v1397_v59 }
 0x3b2   : > { %v1373_v4 = vpop.permute.xlu1 %1372 }
 0x3b3   : > { %v1556_v58 = vmul.f32 %v2411_v17, %v1373_v4  ;;  %v663_v17 = vld [vmem:[#allocation2] sm:$0xff] }
 0x3b5   : > { %v1718_v42 = vadd.f32 %v1717_v6, %v1556_v58 }
 0x3b7   : > { %v1719_v60 = vadd.f32 %v1718_v42, %v1557_v63 }
 0x3b9   : > { %v1720_v40 = vadd.f32 %v1719_v60, %v1558_v12 }
 0x3ba   : > { %v1409_v52 = vpop.permute.xlu2 %1408 }
 0x3bb   : > { %v1562_v34 = vmul.f32 %v2423_v62, %v1409_v52 }
 0x3c2   : > { %v1391_v7 = vpop.permute.xlu1 %1390 }
 0x3c3   : > { %v1559_v20 = vmul.f32 %v2416_v57, %v1391_v7 }
 0x3c5   : > { %v1721_v23 = vadd.f32 %v1720_v40, %v1559_v20 }
 0x3c7   : > { %v1722_v28 = vadd.f32 %v1721_v23, %v1560_v10 }
 0x3ca   : > { %v1427_v1 = vpop.permute.xlu2 %1426 }
 0x3cb   : > { %v1565_v46 = vmul.f32 %v2428_v48, %v1427_v1 }
 0x3d2   : > { %v1403_v30 = vpop.permute.xlu1 %1402 }
 0x3d3   : > { %v1561_v53 = vmul.f32 %v2420_v2, %v1403_v30 }
 0x3d5   : > { %v1723_v13 = vadd.f32 %v1722_v28, %v1561_v53 }
 0x3d7   : > { %v1724_v21 = vadd.f32 %v1723_v13, %v1562_v34 }
 0x3d9   : > { %v1725_v27 = vadd.f32 %v1724_v21, %v1563_v14 }
 0x3da   : > { %v1439_v18 = vpop.permute.xlu2 %1438 }
 0x3db   : > { %v1567_v49 = vmul.f32 %v2432_v19, %v1439_v18 }
 0x3e2   : > { %v1421_v37 = vpop.permute.xlu1 %1420 }
 0x3e3   : > { %v1564_v39 = vmul.f32 %v2427_v25, %v1421_v37 }
 0x3e5   : > { %v1726_v33 = vadd.f32 %v1725_v27, %v1564_v39 }
 0x3e7   : > { %v1727_v51 = vadd.f32 %v1726_v33, %v1565_v46 }
 0x3f2   : > { %v1433_v32 = vpop.permute.xlu1 %1432 }
 0x3f3   : > { %v1566_v50 = vmul.f32 %v2431_v5, %v1433_v32 }
 0x3f5   : > { %v1728_v9 = vadd.f32 %v1727_v51, %v1566_v50 }
 0x3f7   : > { %v1729_v15 = vadd.f32 %v1728_v9, %v1567_v49 }
 0x3f9   : > { %v1730_v24 = vrot.slane %v1729_v15, 4 }
 0x3fb   : > { %v1731_v38 = vadd.f32 %v1730_v24, %v1729_v15 }
 0x3fd   : > { %v1732_v36 = vrot.slane %v1731_v38, 2 }
 0x3ff   : > { %v1733_v44 = vadd.f32 %v1732_v36, %v1731_v38 }
 0x401   : > { %v1734_v26 = vrot.slane %v1733_v44, 1 }
 0x403   : > { %v1735_v4 = vadd.f32 %v1734_v26, %v1733_v44 }
 0x404   : > { %1770 = sbr.rel (%p2171_p1) target bundleno = 1437 (0x59d), region = 72 }
 0x405   : > { %v1757_v61 = vsel %vm1756_vm8, %v1735_v4, %v3618_v54 }
 0x406   : > { %v1759_v11 = vadd.f32 %v1757_v61, %v663_v17 }
 0x408   : > { %1760 = vst [vmem:[#allocation2] sm:$0xff] %v1759_v11 }
 0x409   : > { %v1771_v22 = vld [vmem:[#allocation3] sm:$0xff]  ;;  %v1840_v35 = vld [vmem:[#allocation9 + $0x170] sm:$0xff]  ;;  %v2956_v45 = vmov 0   ;;  %v1841_v0 = vld [vmem:[#allocation9 + $0x178] sm:$0xff] }
 0x40a   : > { %v1839_v58 = vld [vmem:[#allocation9 + $0x168] sm:$0xff]  ;;  %2724 = vset.pattern.permute.xlu0 %v2956_v45  ;;  %v1772_v6 = vmax.f32 %v1771_v22, 1.0  ;;  %v1836_v42 = vld [vmem:[#allocation9 + $0x150] sm:$0xff]  ;;  %v1837_v63 = vld [vmem:[#allocation9 + $0x158] sm:$0xff]  ;;  %1870 = vmatpush.msra.mxu1 %v1840_v35 }
 0x40b   : > { %1850 = vmatpush.msra.mxu0 %v1839_v58  ;;  %1890 = vmatpush.msra.mxu2 %v1841_v0  ;;  %v1838_v7 = vld [vmem:[#allocation9 + $0x160] sm:$0xff]  ;;  %v1833_v57 = vld [vmem:[#allocation9 + $0x138] sm:$0xff]  ;;  %v1835_v59 = vld [vmem:[#allocation9 + $0x148] sm:$0xff] }
 0x40c   : > { %2726 = vrcp.f32 %v1772_v6  ;;  %v1834_v54 = vld [vmem:[#allocation9 + $0x140] sm:$0xff]  ;;  %1871 = vmatpush.msra.mxu1 %v1837_v63  ;;  %v1831_v12 = vld [vmem:[#allocation9 + $0x128] sm:$0xff]  ;;  %v1832_v60 = vld [vmem:[#allocation9 + $0x130] sm:$0xff]  ;;  %v1785_v52 = vand.u32 2147483648, %v1772_v6  ;;  %vm1779_vm9 = vweird.f32 %v1772_v6  ;;  %v1783_v55 = vand.u32 2147483647, %v1772_v6 }
 0x40d   : > { %1851 = vmatpush.msra.mxu0 %v1836_v42  ;;  %1891 = vmatpush.msra.mxu2 %v1838_v7  ;;  %v1830_v41 = vld [vmem:[#allocation9 + $0x120] sm:$0xff]  ;;  %v1827_v20 = vld [vmem:[#allocation9 + $0x108] sm:$0xff]  ;;  %v1828_v56 = vld [vmem:[#allocation9 + $0x110] sm:$0xff] }
 0x40e   : > { %1872 = vmatpush.msra.mxu1 %v1834_v54  ;;  %v1829_v40 = vld [vmem:[#allocation9 + $0x118] sm:$0xff]  ;;  %v1824_v2 = vld [vmem:[#allocation9 + $0xf0] sm:$0xff]  ;;  %v1826_v23 = vld [vmem:[#allocation9 + $0x100] sm:$0xff]  ;;  %v1786_v25 = vor.u32 1.1754944e-38, %v1785_v52  ;;  %vm1784_vm12 = vcmp.eq.f32.partialorder %v1783_v55, 8.507059e+37 }
 0x40f   : > { %1852 = vmatpush.msra.mxu0 %v1833_v57  ;;  %1892 = vmatpush.msra.mxu2 %v1835_v59  ;;  %v1825_v30 = vld [vmem:[#allocation9 + $0xf8] sm:$0xff]  ;;  %v1822_v53 = vld [vmem:[#allocation9 + $0xe0] sm:$0xff]  ;;  %v1823_v62 = vld [vmem:[#allocation9 + $0xe8] sm:$0xff] }
 0x410   : > { %1873 = vmatpush.msra.mxu1 %v1831_v12  ;;  %v1821_v29 = vld [vmem:[#allocation9 + $0xd8] sm:$0xff]  ;;  %v1818_v13 = vld [vmem:[#allocation9 + $0xc0] sm:$0xff]  ;;  %v1819_v34 = vld [vmem:[#allocation9 + $0xc8] sm:$0xff] }
 0x411   : > { %1853 = vmatpush.msra.mxu0 %v1830_v41  ;;  %1893 = vmatpush.msra.mxu2 %v1832_v60  ;;  %v1820_v47 = vld [vmem:[#allocation9 + $0xd0] sm:$0xff]  ;;  %v1815_v3 = vld [vmem:[#allocation9 + $0xa8] sm:$0xff]  ;;  %v1817_v1 = vld [vmem:[#allocation9 + $0xb8] sm:$0xff] }
 0x412   : > { %v2727_v16 = vpop.eup %2726  ;;  %1874 = vmatpush.msra.mxu1 %v1828_v56  ;;  %v1816_v37 = vld [vmem:[#allocation9 + $0xb0] sm:$0xff]  ;;  %v1813_v39 = vld [vmem:[#allocation9 + $0x98] sm:$0xff]  ;;  %v1814_v31 = vld [vmem:[#allocation9 + $0xa0] sm:$0xff] }
 0x413   : > { %1854 = vmatpush.msra.mxu0 %v1827_v20  ;;  %v1775_v10 = vmul.f32 %v2727_v16, %v1772_v6  ;;  %1894 = vmatpush.msra.mxu2 %v1829_v40  ;;  %vm1780_vm10 = vweird.f32 %v2727_v16  ;;  %v1812_v14 = vld [vmem:[#allocation9 + $0x90] sm:$0xff]  ;;  %v1809_v27 = vld [vmem:[#allocation9 + $0x78] sm:$0xff]  ;;  %v1810_v46 = vld [vmem:[#allocation9 + $0x80] sm:$0xff] }
 0x414   : > { %1875 = vmatpush.msra.mxu1 %v1825_v30  ;;  %vm3632_vm11 = vmor %vm1779_vm9, %vm1780_vm10  ;;  %v1811_v5 = vld [vmem:[#allocation9 + $0x88] sm:$0xff]  ;;  %v1806_v19 = vld [vmem:[#allocation9 + $0x60] sm:$0xff] }
 0x415   : > { %1855 = vmatpush.msra.mxu0 %v1824_v2  ;;  %v1776_v28 = vsub.f32 1.0, %v1775_v10  ;;  %1895 = vmatpush.msra.mxu2 %v1826_v23  ;;  %v1807_v18 = vld [vmem:[#allocation9 + $0x68] sm:$0xff]  ;;  %v1808_v32 = vld [vmem:[#allocation9 + $0x70] sm:$0xff]  ;;  %v1805_v49 = vld [vmem:[#allocation9 + $0x58] sm:$0xff] }
 0x416   : > { %1876 = vmatpush.msra.mxu1 %v1822_v53  ;;  %v1803_v51 = vld [vmem:[#allocation9 + $0x48] sm:$0xff]  ;;  %v1804_v50 = vld [vmem:[#allocation9 + $0x50] sm:$0xff]  ;;  %v1801_v15 = vld [vmem:[#allocation9 + $0x38] sm:$0xff] }
 0x417   : > { %1856 = vmatpush.msra.mxu0 %v1821_v29  ;;  %v1777_v43 = vmul.f32 %v2727_v16, %v1776_v28  ;;  %1896 = vmatpush.msra.mxu2 %v1823_v62  ;;  %v1800_v9 = vld [vmem:[#allocation9 + $0x30] sm:$0xff]  ;;  %v1802_v24 = vld [vmem:[#allocation9 + $0x40] sm:$0xff]  ;;  %v1797_v38 = vld [vmem:[#allocation9 + $0x18] sm:$0xff] }
 0x418   : > { %1877 = vmatpush.msra.mxu1 %v1819_v34  ;;  %v1798_v36 = vld [vmem:[#allocation9 + $0x20] sm:$0xff]  ;;  %v1799_v44 = vld [vmem:[#allocation9 + $0x28] sm:$0xff]  ;;  %v1796_v4 = vld [vmem:[#allocation9 + $0x10] sm:$0xff] }
 0x419   : > { %1857 = vmatpush.msra.mxu0 %v1818_v13  ;;  %v1778_v21 = vadd.f32 %v2727_v16, %v1777_v43  ;;  %1897 = vmatpush.msra.mxu2 %v1820_v47  ;;  %v1794_v26 = vld [vmem:[#allocation9] sm:$0xff]  ;;  %v1795_v17 = vld [vmem:[#allocation9 + $0x8] sm:$0xff]  ;;  %v1924_v22 = vld [vmem:[#allocation12 + $0x70] sm:$0xff] }
 0x41a   : > { %1878 = vmatpush.msra.mxu1 %v1816_v37  ;;  %v1925_v61 = vld [vmem:[#allocation12 + $0x78] sm:$0xff]  ;;  %v1940_v58 = vld [vmem:[#allocation12 + $0xf0] sm:$0xff]  ;;  %v1923_v35 = vld [vmem:[#allocation12 + $0x68] sm:$0xff] }
 0x41b   : > { %1858 = vmatpush.msra.mxu0 %v1815_v3  ;;  %v1782_v48 = vsel %vm3632_vm11, %v2727_v16, %v1778_v21  ;;  %1898 = vmatpush.msra.mxu2 %v1817_v1  ;;  %v1941_v11 = vld [vmem:[#allocation12 + $0xf8] sm:$0xff]  ;;  %v1939_v45 = vld [vmem:[#allocation12 + $0xe8] sm:$0xff]  ;;  %v1956_v0 = vld [vmem:[#allocation12 + $0x170] sm:$0xff] }
 0x41c   : > { %v1787_v33 = vsel %vm1784_vm12, %v1786_v25, %v1782_v48  ;;  %1879 = vmatpush.msra.mxu1 %v1813_v39  ;;  %1962 = vmatpush.msra.mxu3 %v1925_v61  ;;  %v1957_v6 = vld [vmem:[#allocation12 + $0x178] sm:$0xff]  ;;  %v1922_v42 = vld [vmem:[#allocation12 + $0x60] sm:$0xff]  ;;  %v1955_v7 = vld [vmem:[#allocation12 + $0x168] sm:$0xff] }
 0x41d   : > { %1859 = vmatpush.msra.mxu0 %v1812_v14  ;;  %1790 = vperm.xlu0 %2724, %v1787_v33   ;;  %v1938_v63 = vld [vmem:[#allocation12 + $0xe0] sm:$0xff]  ;;  %v1921_v57 = vld [vmem:[#allocation12 + $0x58] sm:$0xff]  ;;  %v1920_v41 = vld [vmem:[#allocation12 + $0x50] sm:$0xff] }
 0x41e   : > { %1899 = vmatpush.msra.mxu2 %v1814_v31  ;;  %1880 = vmatpush.msra.mxu1 %v1810_v46  ;;  %v1937_v54 = vld [vmem:[#allocation12 + $0xd8] sm:$0xff]  ;;  %v1954_v59 = vld [vmem:[#allocation12 + $0x160] sm:$0xff]  ;;  %v1936_v12 = vld [vmem:[#allocation12 + $0xd0] sm:$0xff] }
 0x41f   : > { %1860 = vmatpush.msra.mxu0 %v1809_v27  ;;  %1963 = vmatpush.msra.mxu3 %v1924_v22  ;;  %v1953_v60 = vld [vmem:[#allocation12 + $0x158] sm:$0xff]  ;;  %v1919_v20 = vld [vmem:[#allocation12 + $0x48] sm:$0xff]  ;;  %v1952_v40 = vld [vmem:[#allocation12 + $0x150] sm:$0xff] }
 0x420   : > { %1900 = vmatpush.msra.mxu2 %v1811_v5  ;;  %1881 = vmatpush.msra.mxu1 %v1807_v18  ;;  %v1935_v56 = vld [vmem:[#allocation12 + $0xc8] sm:$0xff]  ;;  %v1918_v2 = vld [vmem:[#allocation12 + $0x40] sm:$0xff]  ;;  %v1917_v23 = vld [vmem:[#allocation12 + $0x38] sm:$0xff] }
 0x421   : > { %1861 = vmatpush.msra.mxu0 %v1806_v19  ;;  %1964 = vmatpush.msra.mxu3 %v1923_v35  ;;  %v1934_v16 = vld [vmem:[#allocation12 + $0xc0] sm:$0xff]  ;;  %v1951_v30 = vld [vmem:[#allocation12 + $0x148] sm:$0xff]  ;;  %v1933_v10 = vld [vmem:[#allocation12 + $0xb8] sm:$0xff] }
 0x422   : > { %1901 = vmatpush.msra.mxu2 %v1808_v32  ;;  %1882 = vmatpush.msra.mxu1 %v1804_v50  ;;  %v1950_v29 = vld [vmem:[#allocation12 + $0x140] sm:$0xff]  ;;  %v1916_v52 = vld [vmem:[#allocation12 + $0x30] sm:$0xff]  ;;  %v1949_v62 = vld [vmem:[#allocation12 + $0x138] sm:$0xff] }
 0x423   : > { %1862 = vmatpush.msra.mxu0 %v1803_v51  ;;  %1965 = vmatpush.msra.mxu3 %v1922_v42  ;;  %v1932_v53 = vld [vmem:[#allocation12 + $0xb0] sm:$0xff]  ;;  %v1915_v28 = vld [vmem:[#allocation12 + $0x28] sm:$0xff]  ;;  %v1914_v34 = vld [vmem:[#allocation12 + $0x20] sm:$0xff] }
 0x424   : > { %1902 = vmatpush.msra.mxu2 %v1805_v49  ;;  %1883 = vmatpush.msra.mxu1 %v1801_v15  ;;  %v1931_v55 = vld [vmem:[#allocation12 + $0xa8] sm:$0xff]  ;;  %v1948_v13 = vld [vmem:[#allocation12 + $0x130] sm:$0xff]  ;;  %v1930_v47 = vld [vmem:[#allocation12 + $0xa0] sm:$0xff] }
 0x425   : > { %1863 = vmatpush.msra.mxu0 %v1800_v9  ;;  %1966 = vmatpush.msra.mxu3 %v1921_v57  ;;  %v1947_v43 = vld [vmem:[#allocation12 + $0x128] sm:$0xff]  ;;  %v1913_v3 = vld [vmem:[#allocation12 + $0x18] sm:$0xff]  ;;  %v1912_v25 = vld [vmem:[#allocation12 + $0x10] sm:$0xff] }
 0x426   : > { %1903 = vmatpush.msra.mxu2 %v1802_v24  ;;  %1884 = vmatpush.msra.mxu1 %v1798_v36  ;;  %v1929_v8 = vld [vmem:[#allocation12 + $0x98] sm:$0xff]  ;;  %v1928_v37 = vld [vmem:[#allocation12 + $0x90] sm:$0xff]  ;;  %v1911_v39 = vld [vmem:[#allocation12 + $0x8] sm:$0xff] }
 0x427   : > { %1864 = vmatpush.msra.mxu0 %v1797_v38  ;;  %1967 = vmatpush.msra.mxu3 %v1920_v41  ;;  %v1773_v1 = vld [vmem:[#allocation2] sm:$0xff]  ;;  %v1927_v48 = vld [vmem:[#allocation12 + $0x88] sm:$0xff]  ;;  %v1944_v5 = vld [vmem:[#allocation12 + $0x110] sm:$0xff] }
 0x428   : > { %1904 = vmatpush.msra.mxu2 %v1799_v44  ;;  %1885 = vmatpush.msra.mxu1 %v1795_v17  ;;  %v1946_v31 = vld [vmem:[#allocation12 + $0x120] sm:$0xff]  ;;  %v1945_v46 = vld [vmem:[#allocation12 + $0x118] sm:$0xff]  ;;  %v1943_v19 = vld [vmem:[#allocation12 + $0x108] sm:$0xff] }
 0x429   : > { %1865 = vmatpush.msra.mxu0 %v1794_v26  ;;  %1968 = vmatpush.msra.mxu3 %v1919_v20  ;;  %v1910_v27 = vld [vmem:[#allocation12] sm:$0xff]  ;;  %v1842_v32 = vld [vmem:[#allocation10] sm:$0x7] }
 0x42a   : > { %1905 = vmatpush.msra.mxu2 %v1796_v4  ;;  %2002 = vmatpush.msrb.mxu1 %v1957_v6  ;;  %v1926_v33 = vld [vmem:[#allocation12 + $0x80] sm:$0xff]  ;;  %v1844_v51 = vperm.slane %v1842_v32, 0  ;;  %v1845_v50 = vperm.slane %v1842_v32, 1  ;;  %v1846_v38 = vperm.slane %v1842_v32, 2  ;;  %v2725_v26 = vld [vmem:[%s3668_s5] ss:$0 sm:$0xff] }
 0x42b   : > { %1982 = vmatpush.msrb.mxu0 %v1941_v11  ;;  %1969 = vmatpush.msra.mxu3 %v1918_v2  ;;  %v1942_v18 = vld [vmem:[#allocation12 + $0x100] sm:$0xff] }
 0x42c   : > { %2003 = vmatpush.msrb.mxu1 %v1956_v0 }
 0x42d   : > { %1983 = vmatpush.msrb.mxu0 %v1940_v58  ;;  %1970 = vmatpush.msra.mxu3 %v1917_v23 }
 0x42e   : > { %2004 = vmatpush.msrb.mxu1 %v1955_v7 }
 0x42f   : > { %1984 = vmatpush.msrb.mxu0 %v1939_v45  ;;  %1971 = vmatpush.msra.mxu3 %v1916_v52 }
 0x430   : > { %2005 = vmatpush.msrb.mxu1 %v1954_v59 }
 0x431   : > { %1985 = vmatpush.msrb.mxu0 %v1938_v63  ;;  %1972 = vmatpush.msra.mxu3 %v1915_v28 }
 0x432   : > { %2006 = vmatpush.msrb.mxu1 %v1953_v60 }
 0x433   : > { %1986 = vmatpush.msrb.mxu0 %v1937_v54  ;;  %1973 = vmatpush.msra.mxu3 %v1914_v34 }
 0x434   : > { %2007 = vmatpush.msrb.mxu1 %v1952_v40 }
 0x435   : > { %1987 = vmatpush.msrb.mxu0 %v1936_v12  ;;  %1974 = vmatpush.msra.mxu3 %v1913_v3 }
 0x436   : > { %2008 = vmatpush.msrb.mxu1 %v1951_v30 }
 0x437   : > { %1988 = vmatpush.msrb.mxu0 %v1935_v56  ;;  %1975 = vmatpush.msra.mxu3 %v1912_v25 }
 0x438   : > { %2009 = vmatpush.msrb.mxu1 %v1950_v29 }
 0x439   : > { %1989 = vmatpush.msrb.mxu0 %v1934_v16  ;;  %1976 = vmatpush.msra.mxu3 %v1911_v39 }
 0x43a   : > { %2010 = vmatpush.msrb.mxu1 %v1949_v62 }
 0x43b   : > { %1990 = vmatpush.msrb.mxu0 %v1933_v10  ;;  %1977 = vmatpush.msra.mxu3 %v1910_v27 }
 0x43c   : > { %2011 = vmatpush.msrb.mxu1 %v1948_v13 }
 0x43d   : > { %1991 = vmatpush.msrb.mxu0 %v1932_v53 }
 0x43e   : > { %2012 = vmatpush.msrb.mxu1 %v1947_v43 }
 0x43f   : > { %1992 = vmatpush.msrb.mxu0 %v1931_v55 }
 0x440   : > { %2013 = vmatpush.msrb.mxu1 %v1946_v31 }
 0x441   : > { %1993 = vmatpush.msrb.mxu0 %v1930_v47 }
 0x442   : > { %2014 = vmatpush.msrb.mxu1 %v1945_v46 }
 0x443   : > { %1994 = vmatpush.msrb.mxu0 %v1929_v8 }
 0x444   : > { %2015 = vmatpush.msrb.mxu1 %v1944_v5 }
 0x445   : > { %1995 = vmatpush.msrb.mxu0 %v1928_v37 }
 0x446   : > { %2016 = vmatpush.msrb.mxu1 %v1943_v19 }
 0x447   : > { %1996 = vmatpush.msrb.mxu0 %v1927_v48 }
 0x448   : > { %2017 = vmatpush.msrb.mxu1 %v1942_v18 }
 0x449   : > { %1997 = vmatpush.msrb.mxu0 %v1926_v33 }
 0x48f   : > { %v1791_v21 = vpop.permute.xlu0 %1790 }
 0x490   : > { %v1793_v14 = vmul.f32 %v1791_v21, %v1773_v1 }
 0x492   : > { %1866 = vmatmul.f32.vlgmr.msra.gmra.mxu0 %v1793_v14  ;;  %1886 = vmatmul.f32.vlgmr.msra.gmra.mxu1 %v1793_v14 }
 0x493   : > { %1906 = vmatmul.f32.vlgmr.msra.gmra.mxu2 %v1793_v14 }
 0x50f   : > { %v1867_v49 = vpop.f32.mrf.mxu0  ;;  %v1887_v9 = vpop.f32.mrf.mxu1 }
 0x510   : > { %v1868_v15 = vadd.f32 %v1867_v49, %v1844_v51  ;;  %v1888_v24 = vadd.f32 %v1887_v9, %v1845_v50 }
 0x512   : > { %1978 = vmatmul.f32.vlgmr.msra.gmra.mxu3 %v1868_v15  ;;  %1998 = vmatmul.f32.vlgmr.msrb.gmra.mxu0 %v1888_v24 }
 0x516   : > { %v1907_v36 = vpop.f32.mrf.mxu2 }
 0x517   : > { %v1908_v44 = vadd.f32 %v1907_v36, %v1846_v38 }
 0x519   : > { %2018 = vmatmul.f32.vlgmr.msrb.gmra.mxu1 %v1908_v44 }
 0x58f   : > { %v1999_v61 = vpop.f32.mrf.mxu0 }
 0x595   : > { %v1979_v17 = vpop.f32.mrf.mxu3 }
 0x596   : > { %v1980_v4 = vadd.f32 %v2725_v26, %v1979_v17  ;;  %v2019_v22 = vpop.f32.mrf.mxu1 }
 0x598   : > { %v2000_v11 = vadd.f32 %v1999_v61, %v1980_v4 }
 0x59a   : > { %v2020_v58 = vadd.f32 %v2019_v22, %v2000_v11 }
 0x59c   : > { %2022 = vst [vmem:[#allocation13] sm:$0xff] %v2020_v58 }
 0x59d PF: > { %p2539_p2 = scmp.eq.s32.totalorder %s3022_s27, 1  ;;  %s2033_s29 = sshll.u32 %s3669_s6, 4  ;;  %s2034_s29 = int_to_ptr.hbm [resolvable:$true] %s2033_s29 }
 0x59e   : > { %s2957_s12 = smov [#allocation13]  }
 0x59f   : > { %s2031_s14 = sshll.u32 %s2957_s12, 4  ;;  %s2032_s14 = int_to_ptr.vmem [resolvable:$true] %s2031_s14 }
 0x5a0   : > { %2520 = dma.vmem_to_hbm [thread:$0]  (%p2539_p2), %s2032_s14, 128, %s2034_s29, [#allocation6]  }
 0x5a1   : > { %2915 = dma.done.wait (%p2539_p2), [#allocation6], 128  }
 0x5a2   : > { %2917 = vsyncadd (%p2539_p2), [#allocation6], 4294967168 }
 0x5a3 PF: > { %s24_s26 = sadd.s32 1, %s2940_s26   ;;  %s3720_s27 = sld [smem:[#allocation22_spill]] }
 0x5a4   : > { %p21_p3 = scmp.ge.s32.totalorder %s24_s26, 4   ;;  %s3721_s21 = smov %s2924_s22 }
 0x5a5   : > { %s3722_s22 = smov %s2928_s23  ;;  %s3723_s23 = smov %s3048_s9 }
 0x5a6   : > { %s3724_s24 = smov %s2936_s25  ;;  %23 = sbr.rel (!%p21_p3) target bundleno = 11 (0xb), region = 120 }
 0x5a9   : > { %s3725_s25 = smov %s3720_s27 }
 0x5ab   :  { %2047 = vsyncpa [#allocation5], 1 }
 0x5ac   :  { %2049 = vsyncpa [#allocation5 + $0x1], 1 }
 0x5ad   :  { %2050 = vsyncpa [#allocation8], 1 }
 0x5ae   :  { %2052 = vsyncpa [#allocation8 + $0x1], 1 }
 0x5af   :  { %2053 = vsyncpa [#allocation11], 1 }
 0x5b0   :  { %2054 = vsyncpa [#allocation6], 1 }
 0x5b1   :  { %2056 = vsyncpa [#allocation6 + $0x1], 1 }

</bundles_post_ra>
